<compile_context>
chip_gen: v5e
topology: v5e:2x2
jax: 0.10.0
libtpu: 0.0.40
codegen_flags: <defaults>
</compile_context>

<pallas_src>
import functools

import jax
import jax.numpy as jnp
from jax import lax
from jax.experimental import pallas as pl
from jax.experimental.pallas import tpu as pltpu

BN_EPS = 1e-5


def _round_up(x, m):
    return (x + m - 1) // m * m


def roofn3d_kernel(
    x_ref,      # (C_in, TILE_N) f32, zero-padded past n_points
    w1_ref,     # (64, C_in)  bf16, BN-folded
    w2_ref,     # (128, 64)   bf16, BN-folded
    w3_ref,     # (256, 128)  bf16, BN-folded
    wf1_ref,    # (128, 256)  f32
    wf2_ref,    # (64, 128)   f32
    wf3_ref,    # (out, 64)   f32
    pk_ref,     # (256, 8)    f32 packed per-channel biases
    out_ref,    # (out, 1)    f32
    acc_ref,    # (256, 1)    f32 scratch: running sum of relu(h3) columns
    *,
    n_points,
    tile_n,
    out_channels,
):
    pid = pl.program_id(0)
    last = pl.num_programs(0) - 1

    @pl.when(pid == 0)
    def _():
        acc_ref[...] = jnp.zeros_like(acc_ref)
        out_ref[...] = jnp.zeros_like(out_ref)

    # conv1/2/3 (1x1) + eval-mode BN (folded) + ReLU, streamed over this tile.
    x = x_ref[...].astype(jnp.bfloat16)
    h = jnp.dot(w1_ref[...], x, preferred_element_type=jnp.float32)
    h = jnp.maximum(h + pk_ref[0:64, 0:1], 0.0).astype(jnp.bfloat16)
    h = jnp.dot(w2_ref[...], h, preferred_element_type=jnp.float32)
    h = jnp.maximum(h + pk_ref[0:128, 1:2], 0.0).astype(jnp.bfloat16)
    h = jnp.dot(w3_ref[...], h, preferred_element_type=jnp.float32)
    h = jnp.maximum(h + pk_ref[:, 2:3], 0.0)              # (256, TILE_N) f32

    # Fused mean-pool accumulation; padded lanes only exist in the last tile.
    rem = n_points % tile_n            # static (Python int)
    if rem == 0:
        acc_ref[...] += jnp.sum(h, axis=1, keepdims=True)
    else:
        @pl.when(pid != last)
        def _():
            acc_ref[...] += jnp.sum(h, axis=1, keepdims=True)

        @pl.when(pid == last)
        def _():
            maskf = (lax.broadcasted_iota(jnp.int32, (1, tile_n), 1)
                     < rem).astype(jnp.float32)
            acc_ref[...] += jnp.sum(h * maskf, axis=1, keepdims=True)

    # Finalize on the last tile: mean + FC head (tiny, column form, f32).
    @pl.when(pid == last)
    def _():
        pooled = acc_ref[...] * (1.0 / float(n_points))    # (256, 1)
        f = jnp.dot(wf1_ref[...], pooled, preferred_element_type=jnp.float32)
        f = jnp.maximum(f + pk_ref[0:128, 3:4], 0.0)       # (128, 1)
        f = jnp.dot(wf2_ref[...], f, preferred_element_type=jnp.float32)
        f = jnp.maximum(f + pk_ref[128:192, 3:4], 0.0)     # (64, 1)
        out = jnp.dot(wf3_ref[...], f, preferred_element_type=jnp.float32)
        out_ref[...] = out + pk_ref[0:out_channels, 4:5]   # (out, 1)


@functools.partial(jax.jit, static_argnames=("out_channels",))
def roofn3d_pointnet(x_ncl, kparams, *, out_channels):
    """x_ncl: (1, C_in, N) float32 (PyTorch NCL).  Returns (1, out_channels)."""
    assert x_ncl.shape[0] == 1, "out.view(1, -1) in the reference forces batch==1"
    x = x_ncl[0]                                    # (C_in, N), channels-major
    c_in, n = x.shape

    # Lane-dense tiling: pad N to a multiple of 256 lanes, tile at <=4096.
    tile_n = min(4096, _round_up(n, 256))
    padded_n = _round_up(n, tile_n)
    if padded_n != n:
        x = jnp.pad(x, ((0, 0), (0, padded_n - n)))
    num_tiles = padded_n // tile_n

    kernel = functools.partial(roofn3d_kernel, n_points=n, tile_n=tile_n,
                               out_channels=out_channels)

    args = (
        x,
        kparams["w1"], kparams["w2"], kparams["w3"],
        kparams["wf1"], kparams["wf2"], kparams["wf3"],
        kparams["packed"],
    )

    def resident(shape):                 # weights/bias slab stay in VMEM
        return pl.BlockSpec(shape, lambda i: (0, 0))

    in_specs = [
        pl.BlockSpec((c_in, tile_n), lambda i: (0, i)),     # streamed x tiles
        resident((64, c_in)),
        resident((128, 64)),
        resident((256, 128)),
        resident((128, 256)),
        resident((64, 128)),
        resident((out_channels, 64)),
        resident((256, 8)),
    ]
    out_spec = pl.BlockSpec((out_channels, 1), lambda i: (0, 0))

    flops = (2 * padded_n * (c_in * 64 + 64 * 128 + 128 * 256)
             + 2 * (256 * 128 + 128 * 64 + 64 * out_channels))
    bytes_accessed = (
        c_in * padded_n * 4
        + 2 * (64 * c_in + 128 * 64 + 256 * 128)            # bf16 conv weights
        + 4 * (128 * 256 + 64 * 128 + out_channels * 64)    # f32 head weights
        + 256 * 8 * 4                                       # packed biases
        + out_channels * 4)

    out_col = pl.pallas_call(
        kernel,
        out_shape=jax.ShapeDtypeStruct((out_channels, 1), jnp.float32),
        grid_spec=pltpu.PrefetchScalarGridSpec(
            num_scalar_prefetch=0,
            grid=(num_tiles,),
            in_specs=in_specs,
            out_specs=out_spec,
            scratch_shapes=[pltpu.VMEM((256, 1), jnp.float32)]),
        compiler_params=pltpu.CompilerParams(
            dimension_semantics=("arbitrary",),      # N axis reduces into acc
            vmem_limit_bytes=32 * 1024 * 1024),
        cost_estimate=pl.CostEstimate(
            flops=flops, transcendentals=0, bytes_accessed=bytes_accessed),
    )(*args)
    return out_col.reshape(1, out_channels)


def init_params(key, in_channels, out_channels):
    """Deterministic synthetic parameters in PyTorch layout (out, in),
    including conv biases and BatchNorm running statistics (eval mode)."""
    ks = jax.random.split(key, 24)

    def w(k, fan_out, fan_in):
        return (jax.random.normal(k, (fan_out, fan_in), jnp.float32)
                * (1.0 / jnp.sqrt(fan_in)))

    def v(k, fan_out, scale=0.05):
        return scale * jax.random.normal(k, (fan_out,), jnp.float32)

    def rvar(k, fan_out):
        return 0.5 + jax.random.uniform(k, (fan_out,), jnp.float32)

    return {
        "w1": w(ks[0], 64, in_channels), "b1": v(ks[1], 64),
        "g1": 1.0 + v(ks[2], 64, 0.1), "be1": v(ks[3], 64),
        "m1": v(ks[4], 64, 0.2), "v1": rvar(ks[5], 64),
        "w2": w(ks[6], 128, 64), "b2": v(ks[7], 128),
        "g2": 1.0 + v(ks[8], 128, 0.1), "be2": v(ks[9], 128),
        "m2": v(ks[10], 128, 0.2), "v2": rvar(ks[11], 128),
        "w3": w(ks[12], 256, 128), "b3": v(ks[13], 256),
        "g3": 1.0 + v(ks[14], 256, 0.1), "be3": v(ks[15], 256),
        "m3": v(ks[16], 256, 0.2), "v3": rvar(ks[17], 256),
        "wf1": w(ks[18], 128, 256), "bf1": v(ks[19], 128),
        "wf2": w(ks[20], 64, 128), "bf2": v(ks[21], 64),
        "wf3": w(ks[22], out_channels, 64), "bf3": v(ks[23], out_channels),
    }


def prepare_kernel_params(params, out_channels):
    """Fold eval-mode BatchNorm into the 1x1 conv weights/biases (done once,
    offline), pre-cast the folded conv weights to bf16, and pack every small
    per-channel vector into one (256, 8) f32 slab (single DMA)."""
    assert out_channels <= 256

    def fold(w, b, g, beta, mean, var):
        s = g / jnp.sqrt(var + BN_EPS)
        return (w * s[:, None]).astype(jnp.bfloat16), (b - mean) * s + beta

    w1f, b1f = fold(params["w1"], params["b1"], params["g1"], params["be1"],
                    params["m1"], params["v1"])
    w2f, b2f = fold(params["w2"], params["b2"], params["g2"], params["be2"],
                    params["m2"], params["v2"])
    w3f, b3f = fold(params["w3"], params["b3"], params["g3"], params["be3"],
                    params["m3"], params["v3"])

    pk = jnp.zeros((256, 8), jnp.float32)
    pk = pk.at[0:64, 0].set(b1f)
    pk = pk.at[0:128, 1].set(b2f)
    pk = pk.at[:, 2].set(b3f)
    pk = pk.at[0:128, 3].set(params["bf1"])
    pk = pk.at[128:192, 3].set(params["bf2"])
    pk = pk.at[0:out_channels, 4].set(params["bf3"])

    return {
        "w1": w1f, "w2": w2f, "w3": w3f,
        "wf1": params["wf1"], "wf2": params["wf2"], "wf3": params["wf3"],
        "packed": pk,
    }


def reference_forward(x_ncl, params):
    """Pure-JAX reference: the PyTorch module in eval() mode (BatchNorm uses
    running statistics), with the same numerics as the kernel (BN folded into
    bf16 MXU weights, f32 accumulation) -- the bf16 conv weights are the only
    deliberate fidelity tradeoff vs. f32 Conv1d."""
    x = x_ncl[0]                                         # (C_in, N)

    def layer(w, b, g, beta, mean, var, a):
        s = g / jnp.sqrt(var + BN_EPS)
        wf = (w * s[:, None]).astype(jnp.bfloat16)
        bf = (b - mean) * s + beta
        h = jnp.dot(wf, a.astype(jnp.bfloat16),
                    preferred_element_type=jnp.float32)
        return jnp.maximum(h + bf[:, None], 0.0)

    h = layer(params["w1"], params["b1"], params["g1"], params["be1"],
              params["m1"], params["v1"], x)
    h = layer(params["w2"], params["b2"], params["g2"], params["be2"],
              params["m2"], params["v2"], h)
    h = layer(params["w3"], params["b3"], params["g3"], params["be3"],
              params["m3"], params["v3"], h)
    pooled = jnp.mean(h, axis=1, keepdims=True)          # (256, 1)
    f = jnp.maximum(params["wf1"] @ pooled + params["bf1"][:, None], 0.0)
    f = jnp.maximum(params["wf2"] @ f + params["bf2"][:, None], 0.0)
    out = params["wf3"] @ f + params["bf3"][:, None]
    return out.reshape(1, -1)


if __name__ == "__main__":
    in_channels, out_channels, n_points = 4, 4, 16
    key = jax.random.PRNGKey(0)
    k_x, k_p = jax.random.split(key)

    x = jax.random.normal(k_x, (1, in_channels, n_points), jnp.float32)
    params = init_params(k_p, in_channels, out_channels)
    kparams = prepare_kernel_params(params, out_channels)

    out = roofn3d_pointnet(x, kparams, out_channels=out_channels)
    out = jax.block_until_ready(out)

    ref = reference_forward(x, params)
    assert out.shape == (1, out_channels), out.shape
    assert jnp.allclose(out, ref, atol=1e-3, rtol=1e-3), (out, ref)
    print("KERNEL_OK")
</pallas_src>

<mosaic_0001>
module attributes {stable_mosaic.version = 11 : i64} {
  func.func @roofn3d_kernel(%arg0: i32, %arg1: memref<4x256xf32, #tpu.memory_space<vmem>>, %arg2: memref<64x4xbf16, #tpu.memory_space<vmem>>, %arg3: memref<128x64xbf16, #tpu.memory_space<vmem>>, %arg4: memref<256x128xbf16, #tpu.memory_space<vmem>>, %arg5: memref<128x256xf32, #tpu.memory_space<vmem>>, %arg6: memref<64x128xf32, #tpu.memory_space<vmem>>, %arg7: memref<4x64xf32, #tpu.memory_space<vmem>>, %arg8: memref<256x8xf32, #tpu.memory_space<vmem>>, %arg9: memref<4x1xf32, #tpu.memory_space<vmem>>, %arg10: memref<256x1xf32, #tpu.memory_space<vmem>>) attributes {dimension_semantics = [#tpu.dimension_semantics<arbitrary>], iteration_bounds = array<i64: 1>, scalar_prefetch = 0 : i64, scratch_operands = 1 : i64, tpu.core_type = #tpu.core_type<tc>, window_params = [{transform_indices = @transform_0, window_bounds = array<i64: 4, 256>}, {pipeline_mode = #tpu.pipeline_mode<synchronous>, transform_indices = @transform_1, window_bounds = array<i64: 64, 4>}, {pipeline_mode = #tpu.pipeline_mode<synchronous>, transform_indices = @transform_2, window_bounds = array<i64: 128, 64>}, {pipeline_mode = #tpu.pipeline_mode<synchronous>, transform_indices = @transform_3, window_bounds = array<i64: 256, 128>}, {pipeline_mode = #tpu.pipeline_mode<synchronous>, transform_indices = @transform_4, window_bounds = array<i64: 128, 256>}, {pipeline_mode = #tpu.pipeline_mode<synchronous>, transform_indices = @transform_5, window_bounds = array<i64: 64, 128>}, {pipeline_mode = #tpu.pipeline_mode<synchronous>, transform_indices = @transform_6, window_bounds = array<i64: 4, 64>}, {pipeline_mode = #tpu.pipeline_mode<synchronous>, transform_indices = @transform_7, window_bounds = array<i64: 256, 8>}, {pipeline_mode = #tpu.pipeline_mode<synchronous>, transform_indices = @transform_8, window_bounds = array<i64: 4, 1>}]} {
    %c0_i32 = arith.constant 0 : i32
    %0 = arith.cmpi eq, %arg0, %c0_i32 : i32
    %1 = arith.extui %0 : i1 to i32
    %c0_i32_0 = arith.constant 0 : i32
    %2 = arith.cmpi ne, %1, %c0_i32_0 : i32
    scf.if %2 {
      %cst_23 = arith.constant 0.000000e+00 : f32
      %37 = vector.broadcast %cst_23 : f32 to vector<256x1xf32>
      %c0_24 = arith.constant 0 : index
      %c0_25 = arith.constant 0 : index
      %38 = vector.load %arg10[%c0_24, %c0_25] : memref<256x1xf32, #tpu.memory_space<vmem>>, vector<256x1xf32>
      tpu.vector_store %arg10[%c0_24, %c0_25], %37 {strides = array<i32>} : memref<256x1xf32, #tpu.memory_space<vmem>>, vector<256x1xf32>,
      %cst_26 = arith.constant 0.000000e+00 : f32
      %39 = vector.broadcast %cst_26 : f32 to vector<4x1xf32>
      %c0_27 = arith.constant 0 : index
      %c0_28 = arith.constant 0 : index
      %40 = vector.load %arg9[%c0_27, %c0_28] : memref<4x1xf32, #tpu.memory_space<vmem>>, vector<4x1xf32>
      tpu.vector_store %arg9[%c0_27, %c0_28], %39 {strides = array<i32>} : memref<4x1xf32, #tpu.memory_space<vmem>>, vector<4x1xf32>,
    } else {
    }
    %c0 = arith.constant 0 : index
    %c0_1 = arith.constant 0 : index
    %3 = vector.load %arg1[%c0, %c0_1] : memref<4x256xf32, #tpu.memory_space<vmem>>, vector<4x256xf32>
    %4 = arith.truncf %3 : vector<4x256xf32> to vector<4x256xbf16>
    %c0_2 = arith.constant 0 : index
    %c0_3 = arith.constant 0 : index
    %5 = vector.load %arg2[%c0_2, %c0_3] : memref<64x4xbf16, #tpu.memory_space<vmem>>, vector<64x4xbf16>
    %cst = arith.constant dense<0.000000e+00> : vector<64x256xf32>
    %6 = tpu.matmul %5, %4, %cst {dimension_numbers = #tpu.dot_dimension_numbers<[1], [0], [0], [1], [0, 0, 1, 1], [], []>} : vector<64x4xbf16>, vector<4x256xbf16>, vector<64x256xf32> -> vector<64x256xf32>
    %c0_4 = arith.constant 0 : index
    %c0_5 = arith.constant 0 : index
    %7 = vector.load %arg8[%c0_4, %c0_5] : memref<256x8xf32, #tpu.memory_space<vmem>>, vector<64x1xf32>
    %8 = vector.broadcast %7 : vector<64x1xf32> to vector<64x256xf32>
    %9 = arith.addf %6, %8 : vector<64x256xf32>
    %cst_6 = arith.constant 0.000000e+00 : f32
    %10 = vector.broadcast %cst_6 : f32 to vector<64x256xf32>
    %11 = arith.maximumf %9, %10 : vector<64x256xf32>
    %12 = arith.truncf %11 : vector<64x256xf32> to vector<64x256xbf16>
    %c0_7 = arith.constant 0 : index
    %c0_8 = arith.constant 0 : index
    %13 = vector.load %arg3[%c0_7, %c0_8] : memref<128x64xbf16, #tpu.memory_space<vmem>>, vector<128x64xbf16>
    %cst_9 = arith.constant dense<0.000000e+00> : vector<128x256xf32>
    %14 = tpu.matmul %13, %12, %cst_9 {dimension_numbers = #tpu.dot_dimension_numbers<[1], [0], [0], [1], [0, 0, 1, 1], [], []>} : vector<128x64xbf16>, vector<64x256xbf16>, vector<128x256xf32> -> vector<128x256xf32>
    %c0_10 = arith.constant 0 : index
    %c1 = arith.constant 1 : index
    %15 = vector.load %arg8[%c0_10, %c1] : memref<256x8xf32, #tpu.memory_space<vmem>>, vector<128x1xf32>
    %16 = vector.broadcast %15 : vector<128x1xf32> to vector<128x256xf32>
    %17 = arith.addf %14, %16 : vector<128x256xf32>
    %cst_11 = arith.constant 0.000000e+00 : f32
    %18 = vector.broadcast %cst_11 : f32 to vector<128x256xf32>
    %19 = arith.maximumf %17, %18 : vector<128x256xf32>
    %20 = arith.truncf %19 : vector<128x256xf32> to vector<128x256xbf16>
    %c0_12 = arith.constant 0 : index
    %c0_13 = arith.constant 0 : index
    %21 = vector.load %arg4[%c0_12, %c0_13] : memref<256x128xbf16, #tpu.memory_space<vmem>>, vector<256x128xbf16>
    %cst_14 = arith.constant dense<0.000000e+00> : vector<256x256xf32>
    %22 = tpu.matmul %21, %20, %cst_14 {dimension_numbers = #tpu.dot_dimension_numbers<[1], [0], [0], [1], [0, 0, 1, 1], [], []>} : vector<256x128xbf16>, vector<128x256xbf16>, vector<256x256xf32> -> vector<256x256xf32>
    %c0_15 = arith.constant 0 : index
    %c2 = arith.constant 2 : index
    %23 = vector.load %arg8[%c0_15, %c2] : memref<256x8xf32, #tpu.memory_space<vmem>>, vector<256x1xf32>
    %24 = vector.broadcast %23 : vector<256x1xf32> to vector<256x256xf32>
    %25 = arith.addf %22, %24 : vector<256x256xf32>
    %cst_16 = arith.constant 0.000000e+00 : f32
    %26 = vector.broadcast %cst_16 : f32 to vector<256x256xf32>
    %27 = arith.maximumf %25, %26 : vector<256x256xf32>
    %c0_i32_17 = arith.constant 0 : i32
    %28 = arith.cmpi ne, %arg0, %c0_i32_17 : i32
    %29 = arith.extui %28 : i1 to i32
    %c0_i32_18 = arith.constant 0 : i32
    %30 = arith.cmpi ne, %29, %c0_i32_18 : i32
    scf.if %30 {
      %c0_23 = arith.constant 0 : index
      %c0_24 = arith.constant 0 : index
      %37 = vector.load %arg10[%c0_23, %c0_24] : memref<256x1xf32, #tpu.memory_space<vmem>>, vector<256x1xf32>
      %cst_25 = arith.constant dense<0.000000e+00> : vector<256xf32>
      %38 = vector.multi_reduction <add>, %27, %cst_25 [1] : vector<256x256xf32> to vector<256xf32>
      %39 = vector.shape_cast %38 : vector<256xf32> to vector<256x1xf32>
      %40 = arith.addf %37, %39 : vector<256x1xf32>
      %c0_26 = arith.constant 0 : index
      %c0_27 = arith.constant 0 : index
      %41 = vector.load %arg10[%c0_26, %c0_27] : memref<256x1xf32, #tpu.memory_space<vmem>>, vector<256x1xf32>
      tpu.vector_store %arg10[%c0_26, %c0_27], %40 {strides = array<i32>} : memref<256x1xf32, #tpu.memory_space<vmem>>, vector<256x1xf32>,
    } else {
    }
    %c0_i32_19 = arith.constant 0 : i32
    %31 = arith.cmpi eq, %arg0, %c0_i32_19 : i32
    %32 = arith.extui %31 : i1 to i32
    %c0_i32_20 = arith.constant 0 : i32
    %33 = arith.cmpi ne, %32, %c0_i32_20 : i32
    scf.if %33 {
      %37 = tpu.iota {dimensions = array<i32: 1>} : vector<1x256xi32>
      %c16_i32 = arith.constant 16 : i32
      %38 = vector.broadcast %c16_i32 : i32 to vector<1x256xi32>
      %39 = arith.cmpi slt, %37, %38 : vector<1x256xi32>
      %40 = arith.extui %39 : vector<1x256xi1> to vector<1x256xi32>
      %41 = arith.sitofp %40 : vector<1x256xi32> to vector<1x256xf32>
      %c0_23 = arith.constant 0 : index
      %c0_24 = arith.constant 0 : index
      %42 = vector.load %arg10[%c0_23, %c0_24] : memref<256x1xf32, #tpu.memory_space<vmem>>, vector<256x1xf32>
      %43 = vector.broadcast %41 : vector<1x256xf32> to vector<256x256xf32>
      %44 = arith.mulf %27, %43 : vector<256x256xf32>
      %cst_25 = arith.constant dense<0.000000e+00> : vector<256xf32>
      %45 = vector.multi_reduction <add>, %44, %cst_25 [1] : vector<256x256xf32> to vector<256xf32>
      %46 = vector.shape_cast %45 : vector<256xf32> to vector<256x1xf32>
      %47 = arith.addf %42, %46 : vector<256x1xf32>
      %c0_26 = arith.constant 0 : index
      %c0_27 = arith.constant 0 : index
      %48 = vector.load %arg10[%c0_26, %c0_27] : memref<256x1xf32, #tpu.memory_space<vmem>>, vector<256x1xf32>
      tpu.vector_store %arg10[%c0_26, %c0_27], %47 {strides = array<i32>} : memref<256x1xf32, #tpu.memory_space<vmem>>, vector<256x1xf32>,
    } else {
    }
    %c0_i32_21 = arith.constant 0 : i32
    %34 = arith.cmpi eq, %arg0, %c0_i32_21 : i32
    %35 = arith.extui %34 : i1 to i32
    %c0_i32_22 = arith.constant 0 : i32
    %36 = arith.cmpi ne, %35, %c0_i32_22 : i32
    scf.if %36 {
      %c0_23 = arith.constant 0 : index
      %c0_24 = arith.constant 0 : index
      %37 = vector.load %arg10[%c0_23, %c0_24] : memref<256x1xf32, #tpu.memory_space<vmem>>, vector<256x1xf32>
      %cst_25 = arith.constant 6.250000e-02 : f32
      %38 = vector.broadcast %cst_25 : f32 to vector<256x1xf32>
      %39 = arith.mulf %37, %38 : vector<256x1xf32>
      %c0_26 = arith.constant 0 : index
      %c0_27 = arith.constant 0 : index
      %40 = vector.load %arg5[%c0_26, %c0_27] : memref<128x256xf32, #tpu.memory_space<vmem>>, vector<128x256xf32>
      %cst_28 = arith.constant dense<0.000000e+00> : vector<128x1xf32>
      %41 = tpu.matmul %40, %39, %cst_28 {dimension_numbers = #tpu.dot_dimension_numbers<[1], [0], [0], [1], [0, 0, 1, 1], [], []>} : vector<128x256xf32>, vector<256x1xf32>, vector<128x1xf32> -> vector<128x1xf32>
      %c0_29 = arith.constant 0 : index
      %c3 = arith.constant 3 : index
      %42 = vector.load %arg8[%c0_29, %c3] : memref<256x8xf32, #tpu.memory_space<vmem>>, vector<128x1xf32>
      %43 = arith.addf %41, %42 : vector<128x1xf32>
      %cst_30 = arith.constant 0.000000e+00 : f32
      %44 = vector.broadcast %cst_30 : f32 to vector<128x1xf32>
      %45 = arith.maximumf %43, %44 : vector<128x1xf32>
      %c0_31 = arith.constant 0 : index
      %c0_32 = arith.constant 0 : index
      %46 = vector.load %arg6[%c0_31, %c0_32] : memref<64x128xf32, #tpu.memory_space<vmem>>, vector<64x128xf32>
      %cst_33 = arith.constant dense<0.000000e+00> : vector<64x1xf32>
      %47 = tpu.matmul %46, %45, %cst_33 {dimension_numbers = #tpu.dot_dimension_numbers<[1], [0], [0], [1], [0, 0, 1, 1], [], []>} : vector<64x128xf32>, vector<128x1xf32>, vector<64x1xf32> -> vector<64x1xf32>
      %c128 = arith.constant 128 : index
      %c3_34 = arith.constant 3 : index
      %48 = vector.load %arg8[%c128, %c3_34] : memref<256x8xf32, #tpu.memory_space<vmem>>, vector<64x1xf32>
      %49 = arith.addf %47, %48 : vector<64x1xf32>
      %cst_35 = arith.constant 0.000000e+00 : f32
      %50 = vector.broadcast %cst_35 : f32 to vector<64x1xf32>
      %51 = arith.maximumf %49, %50 : vector<64x1xf32>
      %c0_36 = arith.constant 0 : index
      %c0_37 = arith.constant 0 : index
      %52 = vector.load %arg7[%c0_36, %c0_37] : memref<4x64xf32, #tpu.memory_space<vmem>>, vector<4x64xf32>
      %cst_38 = arith.constant dense<0.000000e+00> : vector<4x1xf32>
      %53 = tpu.matmul %52, %51, %cst_38 {dimension_numbers = #tpu.dot_dimension_numbers<[1], [0], [0], [1], [0, 0, 1, 1], [], []>} : vector<4x64xf32>, vector<64x1xf32>, vector<4x1xf32> -> vector<4x1xf32>
      %c0_39 = arith.constant 0 : index
      %c4 = arith.constant 4 : index
      %54 = vector.load %arg8[%c0_39, %c4] : memref<256x8xf32, #tpu.memory_space<vmem>>, vector<4x1xf32>
      %55 = arith.addf %53, %54 : vector<4x1xf32>
      %c0_40 = arith.constant 0 : index
      %c0_41 = arith.constant 0 : index
      %56 = vector.load %arg9[%c0_40, %c0_41] : memref<4x1xf32, #tpu.memory_space<vmem>>, vector<4x1xf32>
      tpu.vector_store %arg9[%c0_40, %c0_41], %55 {strides = array<i32>} : memref<4x1xf32, #tpu.memory_space<vmem>>, vector<4x1xf32>,
    } else {
    }
    return
  }
  func.func @transform_0(%arg0: i32) -> (i32, i32) {
    %c0_i32 = arith.constant 0 : i32
    %c0_i32_0 = arith.constant 0 : i32
    return %c0_i32, %arg0 : i32, i32
  }
  func.func @transform_1(%arg0: i32) -> (i32, i32) {
    %c0_i32 = arith.constant 0 : i32
    %c0_i32_0 = arith.constant 0 : i32
    %c0_i32_1 = arith.constant 0 : i32
    return %c0_i32, %c0_i32_0 : i32, i32
  }
  func.func @transform_2(%arg0: i32) -> (i32, i32) {
    %c0_i32 = arith.constant 0 : i32
    %c0_i32_0 = arith.constant 0 : i32
    %c0_i32_1 = arith.constant 0 : i32
    return %c0_i32, %c0_i32_0 : i32, i32
  }
  func.func @transform_3(%arg0: i32) -> (i32, i32) {
    %c0_i32 = arith.constant 0 : i32
    %c0_i32_0 = arith.constant 0 : i32
    %c0_i32_1 = arith.constant 0 : i32
    return %c0_i32, %c0_i32_0 : i32, i32
  }
  func.func @transform_4(%arg0: i32) -> (i32, i32) {
    %c0_i32 = arith.constant 0 : i32
    %c0_i32_0 = arith.constant 0 : i32
    %c0_i32_1 = arith.constant 0 : i32
    return %c0_i32, %c0_i32_0 : i32, i32
  }
  func.func @transform_5(%arg0: i32) -> (i32, i32) {
    %c0_i32 = arith.constant 0 : i32
    %c0_i32_0 = arith.constant 0 : i32
    %c0_i32_1 = arith.constant 0 : i32
    return %c0_i32, %c0_i32_0 : i32, i32
  }
  func.func @transform_6(%arg0: i32) -> (i32, i32) {
    %c0_i32 = arith.constant 0 : i32
    %c0_i32_0 = arith.constant 0 : i32
    %c0_i32_1 = arith.constant 0 : i32
    return %c0_i32, %c0_i32_0 : i32, i32
  }
  func.func @transform_7(%arg0: i32) -> (i32, i32) {
    %c0_i32 = arith.constant 0 : i32
    %c0_i32_0 = arith.constant 0 : i32
    %c0_i32_1 = arith.constant 0 : i32
    return %c0_i32, %c0_i32_0 : i32, i32
  }
  func.func @transform_8(%arg0: i32) -> (i32, i32) {
    %c0_i32 = arith.constant 0 : i32
    %c0_i32_0 = arith.constant 0 : i32
    %c0_i32_1 = arith.constant 0 : i32
    return %c0_i32, %c0_i32_0 : i32, i32
  }
}

</mosaic_0001>

<bundles_post_ra>
// kernel: roofn3d_pointnet.1
= control target key start
LH: loop header
LB: loop body
LE: loop exit
PB: predicated region body
PF: predicated region fallthrough
CT: control target
= control target key end

     0   :  { %13 = vsyncpa [#allocation4], 0  ;;  %s2293_s30 = smov [#allocation3]   ;;  %s2294_s10 = smov 128   ;;  %s3320_s0 = inlined_call_operand.vmem [shape: f32[4,256], index: 0, kind: input, shape index: {}]   ;;  %s3321_s1 = inlined_call_operand.vmem [shape: bf16[64,4], index: 1, kind: input, shape index: {}]   ;;  %s3322_s2 = inlined_call_operand.vmem [shape: bf16[128,64], index: 2, kind: input, shape index: {}]   ;;  %s3323_s3 = inlined_call_operand.vmem [shape: bf16[256,128], index: 3, kind: input, shape index: {}]   ;;  %s3324_s4 = inlined_call_operand.vmem [shape: f32[128,256], index: 4, kind: input, shape index: {}]   ;;  %s3325_s5 = inlined_call_operand.hbm [shape: f32[64,128], index: 5, kind: input, shape index: {}]   ;;  %s3326_s6 = inlined_call_operand.vmem [shape: f32[4,64], index: 6, kind: input, shape index: {}]   ;;  %s3327_s7 = inlined_call_operand.vmem [shape: f32[256,8], index: 7, kind: input, shape index: {}]   ;;  %s3328_s8 = inlined_call_operand.vmem [shape: f32[4,1], index: 8, kind: output, shape index: {}]  }
   0x1   :  { %s28_s29 = sshll.u32 %s3325_s5, 4  ;;  %s30_s9 = sshll.u32 %s2293_s30, 4  ;;  %s29_s29 = int_to_ptr.hbm [resolvable:$true] %s28_s29  ;;  %s31_s9 = int_to_ptr.vmem [resolvable:$true] %s30_s9 }
   0x2   :  { %s2295_s11 = smov 8  }
   0x3   :  { %36 = dma.hbm_to_vmem [thread:$0]  %s29_s29, 1024, %s31_s9, [#allocation4], %s2294_s10, %s2294_s10, %s2295_s11  }
   0x4   :  { %2291 = dma.done.wait [#allocation4], 1024  }
   0x5   :  { %2292 = vsyncadd [#allocation4], 4294966272  ;;  %v2296_v0 = vmov 0   ;;  %v2353_v1 = vld [vmem:[%s3327_s7 + $0x30] sm:$0xff]  ;;  %v85_v2 = vld [vmem:[%s3320_s0] sm:$0xff]  ;;  %vm183_vm0 = vcmask 1041408  }
   0x6   :  { %2258 = vset.pattern.permute.xlu0 %v2296_v0  ;;  %2259 = vset.pattern.permute.xlu1 %v2296_v0  ;;  %87 = vst [vmem:[#allocation1] ss:$2 sm:$0xff] %v85_v2  ;;  %v2362_v3 = vld [vmem:[%s3327_s7 + $0x20] sm:$0xff]  ;;  %v2368_v4 = vld [vmem:[%s3327_s7 + $0x38] sm:$0xff]  ;;  %v2373_v5 = vld [vmem:[%s3327_s7 + $0x28] sm:$0xff]  ;;  %vm170_vm1 = vcmask 31744  }
   0x7   :  { %2260 = vset.pattern.permute.xlu2 %v2296_v0  ;;  %142 = vperm.xlu0 %2258, %v2353_v1   ;;  %v2218_v12 = vld [vmem:[%s3321_s1 + $0x10] sm:$0xff]  ;;  %v2216_v13 = vld [vmem:[%s3321_s1] sm:$0xff]  ;;  %v2393_v15 = vld [vmem:[%s3327_s7 + $0x8] sm:$0xff]  ;;  %v2297_v55 = vmov 1   ;;  %vm424_vm2 = vcmask 523264   ;;  %vm50_vm4 = vcmask 7168  }
   0x8   :  { %132 = vperm.xlu1 %2259, %v2362_v3   ;;  %v2386_v14 = vld [vmem:[%s3327_s7] sm:$0xff]  ;;  %v2219_v16 = vld [vmem:[%s3321_s1 + $0x18] sm:$0xff]  ;;  %v2217_v17 = vld [vmem:[%s3321_s1 + $0x8] sm:$0xff]  ;;  %s2300_s30 = smov 125   ;;  %vm83_vm5 = vcmask 3072  }
   0x9   :  { %v2409_v18 = vld [vmem:[%s3327_s7 + $0x10] sm:$0xff]  ;;  %v2416_v19 = vld [vmem:[%s3327_s7 + $0x18] sm:$0xff]  ;;  %v2449_v0 = vld [vmem:[%s3327_s7 + $0x40] sm:$0xff] }
   0xa   :  { %122 = vperm.xlu2 %2260, %v2409_v18   ;;  %v2438_v50 = vld [vmem:[%s3327_s7 + $0x78] sm:$0xff]  ;;  %v2444_v63 = vld [vmem:[%s3327_s7 + $0x70] sm:$0xff] }
   0xd   :  { %v88_v6 = vld.sshfl [vmem:[#allocation1] sm:$0xff pattern:$0x75316420]  ;;  %v89_v7 = vld.sshfl [vmem:[#allocation1 + $0x8] sm:$0xff pattern:$0x75316420] }
   0xe   :  { %v92_v8 = vpack.c.bf16 %v88_v6, %v88_v6  ;;  %v93_v9 = vpack.c.bf16 %v89_v7, %v89_v7  ;;  %v2220_v7 = vld [vmem:[%s3322_s2] sm:$0xff] }
   0xf   :  { %147 = vperm.xlu0 %2258, %v2368_v4  }
  0x10   :  { %137 = vperm.xlu1 %2259, %v2373_v5   ;;  %v185_v10 = vsel %vm183_vm0, %v92_v8, 0  ;;  %v188_v11 = vsel %vm183_vm0, %v93_v9, 0  ;;  %v2459_v8 = vld [vmem:[%s3322_s2 + $0x38] sm:$0xff]  ;;  %v2467_v9 = vld [vmem:[%s3327_s7 + $0x68] sm:$0xff] }
  0x11   :  { %2244 = vmatpush.bf16.msra.mxu3 %v185_v10  ;;  %226 = vmatpush.bf16.msra.mxu1 %v188_v11 }
  0x12   :  { %197 = vmatpush.bf16.msra.mxu0 %v185_v10  ;;  %127 = vperm.xlu2 %2260, %v2416_v19   ;;  %v2472_v10 = vld [vmem:[%s3327_s7 + $0x60] sm:$0xff] }
  0x14   :  { %2096 = vmatmul.msk.bf16.vlgmr.msra.gmra.mxu3 %vm170_vm1, %v2218_v12  ;;  %2098 = vmatmul.msk.bf16.vlgmr.msra.gmra.mxu1 %vm170_vm1, %v2216_v13 }
  0x15   :  { %2094 = vmatmul.msk.bf16.vlgmr.msra.gmra.mxu0 %vm170_vm1, %v2216_v13 }
  0x17   :  { %112 = vperm.xlu0 %2258, %v2386_v14  }
  0x18   :  { %117 = vperm.xlu1 %2259, %v2393_v15  }
  0x1a   :  { %2261 = vset.pattern.permute.xlu2 %v2297_v55 }
  0x1b   :  { %376 = vperm.xlu2 %2261, %v2444_v63  }
  0x1f   :  { %2262 = vset.pattern.permute.xlu0 %v2297_v55 }
  0x20   :  { %381 = vperm.xlu0 %2262, %v2438_v50   ;;  %2263 = vset.pattern.permute.xlu1 %v2297_v55 }
  0x21   :  { %366 = vperm.xlu1 %2263, %v2472_v10  }
  0x23   :  { %371 = vperm.xlu2 %2261, %v2467_v9  }
  0x24   :  { %2097 = vmatmul.msk.bf16.gmra.mxu3 %vm170_vm1, %v2219_v16  ;;  %2099 = vmatmul.msk.bf16.gmra.mxu1 %vm170_vm1, %v2217_v17 }
  0x25   :  { %2095 = vmatmul.msk.bf16.gmra.mxu0 %vm170_vm1, %v2217_v17 }
  0x28   :  { %346 = vperm.xlu0 %2262, %v2449_v0  }
  0x30   :  { %341 = vperm.xlu0 %2262, %v2368_v4  }
  0x34   :  { %2100 = vmatmul.msk.bf16.gmra.mxu1 %vm170_vm1, %v2218_v12 }
  0x38   :  { %316 = vperm.xlu0 %2262, %v2409_v18  }
  0x40   :  { %311 = vperm.xlu0 %2262, %v2393_v15  }
  0x44   :  { %2101 = vmatmul.msk.bf16.gmra.mxu1 %vm170_vm1, %v2219_v16 }
  0x64   :  { %v2429_v30 = vpop.permute.xlu2 %122 }
  0x6c   :  { %v128_v42 = vpop.permute.xlu2 %127 }
  0x79   :  { %v143_v27 = vpop.permute.xlu0 %142 }
  0x7a   :  { %v2427_v28 = vpop.permute.xlu1 %132 }
  0x81   :  { %v148_v34 = vpop.permute.xlu0 %147 }
  0x82   :  { %v138_v35 = vpop.permute.xlu1 %137 }
  0x89   :  { %v113_v53 = vpop.permute.xlu0 %112 }
  0x8a   :  { %v118_v54 = vpop.permute.xlu1 %117 }
  0x91   :  { %v2421_v20 = vpop.f32.mrf.mxu1 }
  0x92   :  { %v199_v21 = vpop.f32.mrf.mxu0 }
  0x93   :  { %v200_v56 = vadd.f32 %v199_v21, %v113_v53 }
  0x95   :  { %v248_v61 = vmax.f32 %v200_v56, 0.0 }
  0x97   :  { %v209_v22 = vpop.f32.mrf.mxu3 }
  0x98   :  { %v210_v38 = vadd.f32 %v209_v22, %v2427_v28 }
  0x99   :  { %v2423_v23 = vpop.f32.mrf.mxu1 }
  0x9a   :  { %v201_v24 = vpop.f32.mrf.mxu0  ;;  %v256_v47 = vmax.f32 %v210_v38, 0.0 }
  0x9b   :  { %v202_v57 = vadd.f32 %v201_v24, %v118_v54 }
  0x9d   :  { %v250_v62 = vmax.f32 %v202_v57, 0.0 }
  0x9f   :  { %v211_v25 = vpop.f32.mrf.mxu3  ;;  %v264_v2 = vpack.c.bf16 %v250_v62, %v248_v61 }
  0xa0   :  { %v212_v39 = vadd.f32 %v211_v25, %v138_v35 }
  0xa1   :  { %v2425_v26 = vpop.f32.mrf.mxu1 }
  0xa2   :  { %v204_v29 = vpop.f32.mrf.mxu0  ;;  %v258_v48 = vmax.f32 %v212_v39, 0.0  ;;  %v2503_v39 = vld [vmem:[%s3327_s7 + $0x48] sm:$0xff] }
  0xa3   :  { %v205_v44 = vadd.f32 %v204_v29, %v2429_v30 }
  0xa4   :  { %v268_v58 = vpack.c.bf16 %v258_v48, %v256_v47  ;;  %v2541_v47 = vpop.permute.xlu2 %376 }
  0xa5   :  { %v252_v51 = vmax.f32 %v205_v44, 0.0  ;;  %v2226_v44 = vld [vmem:[%s3322_s2 + $0x30] sm:$0xff] }
  0xa7   :  { %v214_v31 = vpop.f32.mrf.mxu3 }
  0xa8   :  { %v215_v33 = vadd.f32 %v214_v31, %v143_v27  ;;  %v2482_v31 = vld [vmem:[%s3327_s7 + $0x58] sm:$0xff] }
  0xa9   :  { %v2431_v32 = vpop.f32.mrf.mxu1  ;;  %361 = vperm.xlu2 %2261, %v2482_v31  }
  0xaa   :  { %v206_v37 = vpop.f32.mrf.mxu0  ;;  %v260_v40 = vmax.f32 %v215_v33, 0.0  ;;  %v236_v24 = vadd.f32 %v2431_v32, %v128_v42  ;;  %v234_v33 = vadd.f32 %v2425_v26, %v2429_v30  ;;  %v2221_v32 = vld [vmem:[%s3322_s2 + $0x8] sm:$0xff] }
  0xab   :  { %v207_v46 = vadd.f32 %v206_v37, %v128_v42  ;;  %v229_v37 = vadd.f32 %v2421_v20, %v113_v53  ;;  %v2224_v42 = vld [vmem:[%s3322_s2 + $0x20] sm:$0xff] }
  0xac   :  { %v253_v38 = vmax.f32 %v234_v33, 0.0 }
  0xad   :  { %v254_v52 = vmax.f32 %v207_v46, 0.0 }
  0xaf   :  { %v216_v36 = vpop.f32.mrf.mxu3  ;;  %v266_v60 = vpack.c.bf16 %v254_v52, %v252_v51 }
  0xb0   :  { %v217_v41 = vadd.f32 %v216_v36, %v148_v34 }
  0xb1   :  { %v238_v43 = vpop.f32.mrf.mxu1  ;;  %336 = vperm.xlu2 %2261, %v2353_v1  }
  0xb2   :  { %v262_v45 = vmax.f32 %v217_v41, 0.0  ;;  %v239_v17 = vadd.f32 %v238_v43, %v2427_v28  ;;  %v2223_v41 = vld [vmem:[%s3322_s2 + $0x18] sm:$0xff]  ;;  %v2225_v43 = vld [vmem:[%s3322_s2 + $0x28] sm:$0xff] }
  0xb4   :  { %v270_v49 = vpack.c.bf16 %v262_v45, %v260_v40  ;;  %v257_v28 = vmax.f32 %v239_v17, 0.0  ;;  %v249_v40 = vmax.f32 %v229_v37, 0.0 }
  0xb6   :  { %453 = vmatpush.bf16.msra.mxu2 %v270_v49  ;;  %2245 = vmatpush.bf16.msrb.mxu3 %v270_v49  ;;  %v2544_v49 = vpop.permute.xlu0 %381 }
  0xb9   :  { %v240_v59 = vpop.f32.mrf.mxu1  ;;  %331 = vperm.xlu2 %2261, %v2373_v5  }
  0xba   :  { %454 = vmatpush.bf16.msra.mxu2 %v268_v58  ;;  %2246 = vmatpush.bf16.msrb.mxu3 %v268_v58  ;;  %v241_v13 = vadd.f32 %v240_v59, %v138_v35  ;;  %v255_v35 = vmax.f32 %v236_v24, 0.0  ;;  %v2298_v24 = vmov 2  }
  0xbb   :  { %2266 = vset.pattern.permute.xlu0 %v2298_v24 }
  0xbc   :  { %v259_v25 = vmax.f32 %v241_v13, 0.0  ;;  %v267_v30 = vpack.c.bf16 %v255_v35, %v253_v38 }
  0xbe   :  { %455 = vmatpush.bf16.msra.mxu2 %v266_v60  ;;  %2247 = vmatpush.bf16.msrb.mxu3 %v266_v60  ;;  %v269_v36 = vpack.c.bf16 %v259_v25, %v257_v28  ;;  %v2584_v35 = vpop.permute.xlu0 %346 }
  0xc1   :  { %v243_v6 = vpop.f32.mrf.mxu1  ;;  %306 = vperm.xlu2 %2261, %v2386_v14  }
  0xc2   :  { %456 = vmatpush.bf16.msra.mxu2 %v264_v2  ;;  %2248 = vmatpush.bf16.msrb.mxu3 %v264_v2  ;;  %v244_v11 = vadd.f32 %v243_v6, %v143_v27  ;;  %v2487_v27 = vld [vmem:[%s3327_s7 + $0x50] sm:$0xff] }
  0xc3   :  { %356 = vperm.xlu1 %2263, %v2487_v27  }
  0xc4   :  { %v261_v21 = vmax.f32 %v244_v11, 0.0 }
  0xc5   :  { %2134 = vmatmul.msk.bf16.vlgmr.msra.gmra.mxu2 %vm424_vm2, %v2220_v7  ;;  %2141 = vmatmul.msk.bf16.vlgmr.msrb.gmra.mxu3 %vm424_vm2, %v2459_v8 }
  0xc9   :  { %v245_v12 = vpop.f32.mrf.mxu1  ;;  %2265 = vset.pattern.permute.xlu2 %v2298_v24 }
  0xca   :  { %v246_v16 = vadd.f32 %v245_v12, %v148_v34  ;;  %v231_v34 = vadd.f32 %v2423_v23, %v118_v54  ;;  %v2222_v23 = vld [vmem:[%s3322_s2 + $0x10] sm:$0xff]  ;;  %731 = vperm.xlu2 %2265, %v2444_v63  }
  0xcb   :  { %351 = vperm.xlu1 %2263, %v2503_v39  }
  0xcc   :  { %v263_v22 = vmax.f32 %v246_v16, 0.0  ;;  %v251_v26 = vmax.f32 %v231_v34, 0.0 }
  0xce   :  { %v271_v29 = vpack.c.bf16 %v263_v22, %v261_v21  ;;  %v265_v20 = vpack.c.bf16 %v251_v26, %v249_v40  ;;  %v2569_v21 = vpop.permute.xlu1 %366 }
  0xd0   :  { %502 = vmatpush.bf16.msra.mxu3 %v271_v29  ;;  %v2575_v29 = vpop.permute.xlu2 %371 }
  0xd3   :  { %326 = vperm.xlu1 %2263, %v2362_v3  }
  0xd4   :  { %503 = vmatpush.bf16.msra.mxu3 %v269_v36 }
  0xd5   :  { %2135 = vmatmul.msk.bf16.gmra.mxu2 %vm424_vm2, %v2221_v32 }
  0xd8   :  { %504 = vmatpush.bf16.msra.mxu3 %v267_v30  ;;  %v2596_v30 = vpop.permute.xlu0 %341 }
  0xdb   :  { %321 = vperm.xlu1 %2263, %v2416_v19  }
  0xdc   :  { %505 = vmatpush.bf16.msra.mxu3 %v265_v20 }
  0xdf   :  { %2142 = vmatmul.msk.bf16.vlgmr.msra.gmra.mxu3 %vm424_vm2, %v2220_v7 }
  0xe3   :  { %2264 = vset.pattern.permute.xlu1 %v2298_v24 }
  0xe4   :  { %736 = vperm.xlu1 %2264, %v2438_v50  }
  0xe5   :  { %2136 = vmatmul.msk.bf16.gmra.mxu2 %vm424_vm2, %v2222_v23 }
  0xec   :  { %726 = vperm.xlu1 %2264, %v2467_v9  }
  0xef   :  { %2143 = vmatmul.msk.bf16.gmra.mxu3 %vm424_vm2, %v2221_v32 }
  0xf4   :  { %721 = vperm.xlu1 %2264, %v2472_v10   ;;  %v655_v10 = vld [vmem:[%s3327_s7 + $0xe0] sm:$0xff] }
  0xf5   :  { %2137 = vmatmul.msk.bf16.gmra.mxu2 %vm424_vm2, %v2223_v41 }
  0xfc   :  { %801 = vperm.xlu1 %2264, %v655_v10  }
  0xff   :  { %2144 = vmatmul.msk.bf16.gmra.mxu3 %vm424_vm2, %v2222_v23 }
 0x103   :  { %v2582_v34 = vpop.permute.xlu2 %361 }
 0x104   :  { %706 = vperm.xlu1 %2264, %v2503_v39  }
 0x105   :  { %2138 = vmatmul.msk.bf16.gmra.mxu2 %vm424_vm2, %v2224_v42 }
 0x10b   :  { %v2592_v38 = vpop.permute.xlu2 %336 }
 0x10f   :  { %2145 = vmatmul.msk.bf16.gmra.mxu3 %vm424_vm2, %v2223_v41 }
 0x115   :  { %2139 = vmatmul.msk.bf16.gmra.mxu2 %vm424_vm2, %v2225_v43 }
 0x11f   :  { %2146 = vmatmul.msk.bf16.gmra.mxu3 %vm424_vm2, %v2224_v42 }
 0x125   :  { %2140 = vmatmul.msk.bf16.gmra.mxu2 %vm424_vm2, %v2226_v44 }
 0x12f   :  { %2147 = vmatmul.msk.bf16.gmra.mxu3 %vm424_vm2, %v2225_v43 }
 0x135   :  { %v2578_v28 = vpop.permute.xlu1 %356 }
 0x13d   :  { %v2589_v63 = vpop.permute.xlu1 %351 }
 0x13f   :  { %2148 = vmatmul.msk.bf16.gmra.mxu3 %vm424_vm2, %v2226_v44 }
 0x148   :  { %v2539_v45 = vpop.f32.mrf.mxu2  ;;  %v493_v46 = vpop.f32.mrf.mxu3 }
 0x149   :  { %v494_v48 = vadd.f32 %v493_v46, %v2541_v47 }
 0x14b   :  { %v575_v53 = vmax.f32 %v494_v48, 0.0 }
 0x14f   :  { %2149 = vmatmul.msk.bf16.gmra.mxu3 %vm424_vm2, %v2459_v8 }
 0x150   :  { %v2548_v51 = vpop.f32.mrf.mxu2  ;;  %v495_v52 = vpop.f32.mrf.mxu3 }
 0x151   :  { %v496_v54 = vadd.f32 %v495_v52, %v2544_v49 }
 0x153   :  { %v577_v55 = vmax.f32 %v496_v54, 0.0 }
 0x155   :  { %v593_v56 = vpack.c.bf16 %v577_v55, %v575_v53  ;;  %v2606_v53 = vpop.permute.xlu1 %326  ;;  %v2608_v55 = vpop.permute.xlu2 %331 }
 0x157   :  { %915 = vmatpush.bf16.msrb.mxu0 %v593_v56 }
 0x158   :  { %v2551_v57 = vpop.f32.mrf.mxu2 }
 0x160   :  { %v2553_v58 = vpop.f32.mrf.mxu2 }
 0x162   :  { %v2555_v59 = vpop.f32.mrf.mxu3 }
 0x168   :  { %v468_v60 = vpop.f32.mrf.mxu2 }
 0x16a   :  { %v2557_v61 = vpop.f32.mrf.mxu3 }
 0x170   :  { %v470_v62 = vpop.f32.mrf.mxu2 }
 0x172   :  { %v2559_v2 = vpop.f32.mrf.mxu3 }
 0x178   :  { %v473_v6 = vpop.f32.mrf.mxu2 }
 0x179   :  { %v474_v56 = vadd.f32 %v473_v6, %v2592_v38 }
 0x17a   :  { %v2561_v7 = vpop.f32.mrf.mxu3 }
 0x180   :  { %v475_v8 = vpop.f32.mrf.mxu2 }
 0x182   :  { %v2563_v11 = vpop.f32.mrf.mxu3 }
 0x188   :  { %v478_v12 = vpop.f32.mrf.mxu2 }
 0x189   :  { %v479_v46 = vadd.f32 %v478_v12, %v2584_v35  ;;  %v469_v12 = vadd.f32 %v468_v60, %v2606_v53  ;;  %v657_v60 = vld [vmem:[%s3327_s7 + $0xf0] sm:$0xff] }
 0x18a   :  { %v2565_v13 = vpop.f32.mrf.mxu3  ;;  %811 = vperm.xlu2 %2265, %v657_v60  }
 0x18b   :  { %v563_v24 = vmax.f32 %v479_v46, 0.0 }
 0x190   :  { %v480_v16 = vpop.f32.mrf.mxu2 }
 0x191   :  { %v481_v48 = vadd.f32 %v480_v16, %v2589_v63  ;;  %v471_v16 = vadd.f32 %v470_v62, %v2608_v55  ;;  %v652_v62 = vld [vmem:[%s3327_s7 + $0xc8] sm:$0xff] }
 0x192   :  { %v2567_v17 = vpop.f32.mrf.mxu3  ;;  %786 = vperm.xlu1 %2264, %v652_v62  }
 0x198   :  { %v483_v22 = vpop.f32.mrf.mxu2 }
 0x199   :  { %v484_v9 = vadd.f32 %v483_v22, %v2578_v28  ;;  %v476_v22 = vadd.f32 %v475_v8, %v2596_v30  ;;  %v2619_v8 = vpop.permute.xlu1 %321 }
 0x19a   :  { %v2573_v25 = vpop.f32.mrf.mxu3  ;;  %v466_v10 = vadd.f32 %v2553_v58, %v2619_v8  ;;  %691 = vperm.xlu1 %2264, %v2353_v1   ;;  %v654_v1 = vld [vmem:[%s3327_s7 + $0xd8] sm:$0xff] }
 0x19b   :  { %v567_v42 = vmax.f32 %v484_v9, 0.0  ;;  %v559_v9 = vmax.f32 %v474_v56, 0.0 }
 0x1a0   :  { %v485_v33 = vpop.f32.mrf.mxu2 }
 0x1a1   :  { %v486_v26 = vadd.f32 %v485_v33, %v2582_v34  ;;  %v565_v33 = vmax.f32 %v481_v48, 0.0 }
 0x1a2   :  { %v2580_v32 = vpop.f32.mrf.mxu3 }
 0x1a3   :  { %v569_v43 = vmax.f32 %v486_v26, 0.0  ;;  %v561_v26 = vmax.f32 %v476_v22, 0.0 }
 0x1a5   :  { %v589_v54 = vpack.c.bf16 %v569_v43, %v567_v42  ;;  %v585_v42 = vpack.c.bf16 %v561_v26, %v559_v9  ;;  %v2632_v43 = vpop.permute.xlu2 %306  ;;  %v649_v9 = vld [vmem:[%s3327_s7 + $0xb0] sm:$0xff] }
 0x1a6   :  { %v459_v58 = vadd.f32 %v2539_v45, %v2632_v43  ;;  %771 = vperm.xlu1 %2264, %v649_v9   ;;  %v653_v26 = vld [vmem:[%s3327_s7 + $0xd0] sm:$0xff] }
 0x1a8   :  { %v488_v36 = vpop.f32.mrf.mxu2  ;;  %v547_v56 = vmax.f32 %v459_v58, 0.0 }
 0x1a9   :  { %v489_v37 = vadd.f32 %v488_v36, %v2569_v21  ;;  %v2612_v36 = vpop.permute.xlu0 %316 }
 0x1aa   :  { %v2587_v50 = vpop.f32.mrf.mxu3  ;;  %v464_v6 = vadd.f32 %v2551_v57, %v2612_v36  ;;  %v658_v57 = vld [vmem:[%s3327_s7 + $0xf8] sm:$0xff] }
 0x1ab   :  { %v571_v20 = vmax.f32 %v489_v37, 0.0  ;;  %816 = vperm.xlu0 %2266, %v658_v57  }
 0x1ac   :  { %v551_v46 = vmax.f32 %v464_v6, 0.0 }
 0x1ae   :  { %676 = vperm.xlu1 %2264, %v2416_v19   ;;  %v646_v19 = vld [vmem:[%s3327_s7 + $0x98] sm:$0xff] }
 0x1b0   :  { %v490_v40 = vpop.f32.mrf.mxu2 }
 0x1b1   :  { %v491_v23 = vadd.f32 %v490_v40, %v2575_v29  ;;  %v587_v40 = vpack.c.bf16 %v565_v33, %v563_v24  ;;  %v656_v33 = vld [vmem:[%s3327_s7 + $0xe8] sm:$0xff] }
 0x1b2   :  { %v2599_v41 = vpop.f32.mrf.mxu3  ;;  %806 = vperm.xlu2 %2265, %v656_v33  }
 0x1b3   :  { %v573_v44 = vmax.f32 %v491_v23, 0.0  ;;  %v555_v23 = vmax.f32 %v469_v12, 0.0  ;;  %716 = vperm.xlu0 %2266, %v2482_v31  }
 0x1b5   :  { %v591_v52 = vpack.c.bf16 %v573_v44, %v571_v20  ;;  %v557_v20 = vmax.f32 %v471_v16, 0.0  ;;  %v2636_v44 = vpop.permute.xlu0 %311 }
 0x1b6   :  { %v461_v48 = vadd.f32 %v2548_v51, %v2636_v44  ;;  %v2648_v51 = vld [vmem:[%s3323_s3] sm:$0xff]  ;;  %756 = vperm.xlu1 %2264, %v646_v19  }
 0x1b7   :  { %916 = vmatpush.bf16.msrb.mxu0 %v591_v52  ;;  %v553_v52 = vmax.f32 %v466_v10, 0.0 }
 0x1b8   :  { %v549_v22 = vmax.f32 %v461_v48, 0.0  ;;  %v513_v48 = vadd.f32 %v2559_v2, %v2612_v36 }
 0x1b9   :  { %v581_v24 = vpack.c.bf16 %v553_v52, %v551_v46  ;;  %v520_v46 = vadd.f32 %v2565_v13, %v2608_v55 }
 0x1ba   :  { %v534_v37 = vpop.f32.mrf.mxu3  ;;  %v579_v45 = vpack.c.bf16 %v549_v22, %v547_v56  ;;  %711 = vperm.xlu2 %2265, %v2487_v27  }
 0x1bb   :  { %917 = vmatpush.bf16.msrb.mxu0 %v589_v54  ;;  %v583_v54 = vpack.c.bf16 %v557_v20, %v555_v23  ;;  %796 = vperm.xlu0 %2266, %v654_v1   ;;  %v558_v13 = vmax.f32 %v520_v46, 0.0 }
 0x1be   :  { %661 = vperm.xlu1 %2264, %v2386_v14  }
 0x1bf   :  { %918 = vmatpush.bf16.msrb.mxu0 %v587_v40 }
 0x1c2   :  { %v537_v39 = vpop.f32.mrf.mxu3  ;;  %791 = vperm.xlu2 %2265, %v653_v26  }
 0x1c3   :  { %919 = vmatpush.bf16.msrb.mxu0 %v585_v42  ;;  %701 = vperm.xlu0 %2266, %v2449_v0   ;;  %v538_v27 = vadd.f32 %v537_v39, %v2569_v21  ;;  %v535_v42 = vadd.f32 %v534_v37, %v2582_v34  ;;  %v651_v0 = vld [vmem:[%s3327_s7 + $0xc0] sm:$0xff]  ;;  %v530_v21 = vadd.f32 %v2587_v50, %v2589_v63  ;;  %v650_v50 = vld [vmem:[%s3327_s7 + $0xb8] sm:$0xff] }
 0x1c4   :  { %v525_v39 = vadd.f32 %v2573_v25, %v2596_v30  ;;  %v523_v63 = vadd.f32 %v2567_v17, %v2592_v38  ;;  %v518_v25 = vadd.f32 %v2563_v11, %v2606_v53  ;;  %v2230_v17 = vld [vmem:[%s3323_s3 + $0x10] sm:$0xff]  ;;  %v515_v38 = vadd.f32 %v2561_v7, %v2619_v8 }
 0x1c5   :  { %v572_v62 = vmax.f32 %v538_v27, 0.0  ;;  %v570_v34 = vmax.f32 %v535_v42, 0.0  ;;  %v566_v57 = vmax.f32 %v530_v21, 0.0  ;;  %v510_v11 = vadd.f32 %v2557_v61, %v2636_v44  ;;  %v2728_v61 = vpop.permute.xlu1 %736  ;;  %v2735_v44 = vpop.permute.xlu2 %731 }
 0x1c6   :  { %v560_v30 = vmax.f32 %v523_v63, 0.0  ;;  %v556_v14 = vmax.f32 %v518_v25, 0.0  ;;  %v554_v53 = vmax.f32 %v515_v38, 0.0  ;;  %v508_v7 = vadd.f32 %v2555_v59, %v2632_v43  ;;  %v2232_v59 = vld [vmem:[%s3323_s3 + $0x20] sm:$0xff]  ;;  %v2233_v43 = vld [vmem:[%s3323_s3 + $0x28] sm:$0xff] }
 0x1c7   :  { %920 = vmatpush.bf16.msrb.mxu0 %v583_v54  ;;  %v552_v8 = vmax.f32 %v513_v48, 0.0  ;;  %v550_v2 = vmax.f32 %v510_v11, 0.0  ;;  %v647_v54 = vld [vmem:[%s3327_s7 + $0xa0] sm:$0xff] }
 0x1c8   :  { %v584_v52 = vpack.c.bf16 %v558_v13, %v556_v14  ;;  %v548_v56 = vmax.f32 %v508_v7, 0.0  ;;  %v2299_v13 = vmov 0.0  }
 0x1c9   :  { %v582_v36 = vpack.c.bf16 %v554_v53, %v552_v8  ;;  %56 = vst.msk [vmem:[#allocation2 + $0x28] sm:$0xff] %vm50_vm4, %v2299_v13 }
 0x1ca   :  { %v539_v12 = vpop.f32.mrf.mxu3  ;;  %696 = vperm.xlu2 %2265, %v2368_v4   ;;  %v580_v22 = vpack.c.bf16 %v550_v2, %v548_v56  ;;  %51 = vst.msk [vmem:[#allocation2] sm:$0xff] %vm50_vm4, %v2299_v13 }
 0x1cb   :  { %921 = vmatpush.bf16.msrb.mxu0 %v581_v24  ;;  %v540_v6 = vadd.f32 %v539_v12, %v2575_v29  ;;  %781 = vperm.xlu0 %2266, %v651_v0   ;;  %v2234_v24 = vld [vmem:[%s3323_s3 + $0x30] sm:$0xff]  ;;  %52 = vst.msk [vmem:[#allocation2 + $0x8] sm:$0xff] %vm50_vm4, %v2299_v13 }
 0x1cc   :  { %v645_v0 = vld [vmem:[%s3327_s7 + $0x90] sm:$0xff]  ;;  %53 = vst.msk [vmem:[#allocation2 + $0x10] sm:$0xff] %vm50_vm4, %v2299_v13 }
 0x1cd   :  { %v574_v60 = vmax.f32 %v540_v6, 0.0  ;;  %54 = vst.msk [vmem:[#allocation2 + $0x18] sm:$0xff] %vm50_vm4, %v2299_v13 }
 0x1ce   :  { %55 = vst.msk [vmem:[#allocation2 + $0x20] sm:$0xff] %vm50_vm4, %v2299_v13 }
 0x1cf   :  { %922 = vmatpush.bf16.msrb.mxu0 %v579_v45  ;;  %v592_v37 = vpack.c.bf16 %v574_v60, %v572_v62  ;;  %57 = vst.msk [vmem:[#allocation2 + $0x30] sm:$0xff] %vm50_vm4, %v2299_v13 }
 0x1d0   :  { %58 = vst.msk [vmem:[#allocation2 + $0x38] sm:$0xff] %vm50_vm4, %v2299_v13 }
 0x1d1   :  { %59 = vst.msk [vmem:[#allocation2 + $0x40] sm:$0xff] %vm50_vm4, %v2299_v13 }
 0x1d2   :  { %v542_v16 = vpop.f32.mrf.mxu3  ;;  %923 = vmatmul.bf16.vlgmr.msrb.gmra.mxu0 %v2648_v51  ;;  %776 = vperm.xlu2 %2265, %v650_v50   ;;  %60 = vst.msk [vmem:[#allocation2 + $0x48] sm:$0xff] %vm50_vm4, %v2299_v13 }
 0x1d3   :  { %v543_v31 = vadd.f32 %v542_v16, %v2541_v47  ;;  %v2670_v47 = vld [vmem:[%s3323_s3 + $0x8] sm:$0xff]  ;;  %686 = vperm.xlu0 %2266, %v2373_v5   ;;  %v2235_v16 = vld [vmem:[%s3323_s3 + $0x38] sm:$0xff]  ;;  %61 = vst.msk [vmem:[#allocation2 + $0x50] sm:$0xff] %vm50_vm4, %v2299_v13 }
 0x1d4   :  { %v648_v5 = vld [vmem:[%s3327_s7 + $0xa8] sm:$0xff]  ;;  %62 = vst.msk [vmem:[#allocation2 + $0x58] sm:$0xff] %vm50_vm4, %v2299_v13 }
 0x1d5   :  { %v576_v23 = vmax.f32 %v543_v31, 0.0  ;;  %63 = vst.msk [vmem:[#allocation2 + $0x60] sm:$0xff] %vm50_vm4, %v2299_v13 }
 0x1d6   :  { %64 = vst.msk [vmem:[#allocation2 + $0x68] sm:$0xff] %vm50_vm4, %v2299_v13 }
 0x1d7   :  { %65 = vst.msk [vmem:[#allocation2 + $0x70] sm:$0xff] %vm50_vm4, %v2299_v13 }
 0x1d8   :  { %66 = vst.msk [vmem:[#allocation2 + $0x78] sm:$0xff] %vm50_vm4, %v2299_v13 }
 0x1d9   :  { %67 = vst.msk [vmem:[#allocation2 + $0x80] sm:$0xff] %vm50_vm4, %v2299_v13 }
 0x1da   :  { %v544_v40 = vpop.f32.mrf.mxu3  ;;  %681 = vperm.xlu2 %2265, %v2362_v3   ;;  %v2231_v3 = vld [vmem:[%s3323_s3 + $0x18] sm:$0xff]  ;;  %68 = vst.msk [vmem:[#allocation2 + $0x88] sm:$0xff] %vm50_vm4, %v2299_v13 }
 0x1db   :  { %v545_v20 = vadd.f32 %v544_v40, %v2544_v49  ;;  %v533_v49 = vadd.f32 %v2599_v41, %v2578_v28  ;;  %v528_v28 = vadd.f32 %v2580_v32, %v2584_v35  ;;  %v562_v32 = vmax.f32 %v525_v39, 0.0  ;;  %766 = vperm.xlu0 %2266, %v648_v5   ;;  %v2819_v5 = vld [vmem:[%s3323_s3 + $0x58] sm:$0xff]  ;;  %69 = vst.msk [vmem:[#allocation2 + $0x90] sm:$0xff] %vm50_vm4, %v2299_v13 }
 0x1dc   :  { %70 = vst.msk [vmem:[#allocation2 + $0x98] sm:$0xff] %vm50_vm4, %v2299_v13 }
 0x1dd   :  { %v578_v10 = vmax.f32 %v545_v20, 0.0  ;;  %v568_v41 = vmax.f32 %v533_v49, 0.0  ;;  %v564_v4 = vmax.f32 %v528_v28, 0.0  ;;  %v586_v55 = vpack.c.bf16 %v562_v32, %v560_v30  ;;  %v2236_v20 = vld [vmem:[%s3323_s3 + $0x40] sm:$0xff]  ;;  %71 = vst.msk [vmem:[#allocation2 + $0xa0] sm:$0xff] %vm50_vm4, %v2299_v13 }
 0x1de   :  { %v643_v28 = vld [vmem:[%s3327_s7 + $0x80] sm:$0xff]  ;;  %72 = vst.msk [vmem:[#allocation2 + $0xa8] sm:$0xff] %vm50_vm4, %v2299_v13 }
 0x1df   :  { %v594_v29 = vpack.c.bf16 %v578_v10, %v576_v23  ;;  %v590_v58 = vpack.c.bf16 %v570_v34, %v568_v41  ;;  %v588_v35 = vpack.c.bf16 %v566_v57, %v564_v4  ;;  %v644_v41 = vld [vmem:[%s3327_s7 + $0x88] sm:$0xff]  ;;  %v1357_v4 = vlaneseq  ;;  %73 = vst.msk [vmem:[#allocation2 + $0xb0] sm:$0xff] %vm50_vm4, %v2299_v13 }
 0x1e0   :  { %74 = vst.msk [vmem:[#allocation2 + $0xb8] sm:$0xff] %vm50_vm4, %v2299_v13 }
 0x1e1   :  { %1004 = vmatpush.bf16.msrb.mxu1 %v594_v29  ;;  %v2237_v29 = vld [vmem:[%s3323_s3 + $0x48] sm:$0xff]  ;;  %75 = vst.msk [vmem:[#allocation2 + $0xc0] sm:$0xff] %vm50_vm4, %v2299_v13 }
 0x1e2   :  { %928 = vmatmul.bf16.gmra.mxu0 %v2670_v47  ;;  %761 = vperm.xlu2 %2265, %v647_v54   ;;  %76 = vst.msk [vmem:[#allocation2 + $0xc8] sm:$0xff] %vm50_vm4, %v2299_v13 }
 0x1e3   :  { %671 = vperm.xlu0 %2266, %v2409_v18   ;;  %v2730_v18 = vpop.permute.xlu1 %726  ;;  %77 = vst.msk [vmem:[#allocation2 + $0xd0] sm:$0xff] %vm50_vm4, %v2299_v13 }
 0x1e4   :  { %v2742_v33 = vpop.permute.xlu2 %811  ;;  %78 = vst.msk [vmem:[#allocation2 + $0xd8] sm:$0xff] %vm50_vm4, %v2299_v13 }
 0x1e5   :  { %1005 = vmatpush.bf16.msrb.mxu1 %v592_v37  ;;  %79 = vst.msk [vmem:[#allocation2 + $0xe0] sm:$0xff] %vm50_vm4, %v2299_v13 }
 0x1e6   :  { %80 = vst.msk [vmem:[#allocation2 + $0xe8] sm:$0xff] %vm50_vm4, %v2299_v13 }
 0x1e7   :  { %81 = vst.msk [vmem:[#allocation2 + $0xf0] sm:$0xff] %vm50_vm4, %v2299_v13 }
 0x1e8   :  { %82 = vst.msk [vmem:[#allocation2 + $0xf8] sm:$0xff] %vm50_vm4, %v2299_v13 }
 0x1e9   :  { %1006 = vmatpush.bf16.msrb.mxu1 %v590_v58  ;;  %v2804_v58 = vld [vmem:[%s3323_s3 + $0x50] sm:$0xff]  ;;  %84 = vst.msk [vmem:[%s3328_s8] sm:$0xf] %vm83_vm5, %v2299_v13 }
 0x1ea   :  { %666 = vperm.xlu2 %2265, %v2393_v15  }
 0x1eb   :  { %v2737_v15 = vpop.permute.xlu1 %721  ;;  %751 = vperm.xlu0 %2266, %v645_v0  }
 0x1ed   :  { %1007 = vmatpush.bf16.msrb.mxu1 %v588_v35  ;;  %v1358_v35 = vand.u32 127, %v1357_v4 }
 0x1ef   :  { %vm1360_vm3 = vcmp.lt.s32.totalorder %v1358_v35, 16 }
 0x1f1   :  { %1008 = vmatpush.bf16.msrb.mxu1 %v586_v55  ;;  %v2814_v55 = vsel %vm1360_vm3, 1.0, %v2299_v13 }
 0x1f2   :  { %933 = vmatmul.bf16.gmra.mxu0 %v2230_v17  ;;  %746 = vperm.xlu2 %2265, %v644_v41  }
 0x1f3   :  { %v2744_v12 = vpop.permute.xlu1 %801  ;;  %741 = vperm.xlu0 %2266, %v643_v28   ;;  %v2831_v28 = vld [vmem:[%s3323_s3 + $0x60] sm:$0xff] }
 0x1f5   :  { %1009 = vmatpush.bf16.msrb.mxu1 %v584_v52 }
 0x1f9   :  { %1010 = vmatpush.bf16.msrb.mxu1 %v582_v36 }
 0x1fd   :  { %1011 = vmatpush.bf16.msrb.mxu1 %v580_v22 }
 0x200   :  { %1012 = vmatmul.bf16.vlgmr.msrb.gmra.mxu1 %v2648_v51  ;;  %v2748_v51 = vpop.permute.xlu1 %706 }
 0x202   :  { %938 = vmatmul.bf16.gmra.mxu0 %v2231_v3 }
 0x208   :  { %v2757_v31 = vpop.permute.xlu1 %786 }
 0x20c   :  { %v2746_v45 = vpop.permute.xlu2 %806 }
 0x210   :  { %1017 = vmatmul.bf16.gmra.mxu1 %v2670_v47  ;;  %v2763_v6 = vpop.permute.xlu1 %691 }
 0x212   :  { %943 = vmatmul.bf16.gmra.mxu0 %v2232_v59 }
 0x214   :  { %v2755_v1 = vpop.permute.xlu2 %711 }
 0x218   :  { %v2772_v42 = vpop.permute.xlu1 %771 }
 0x21c   :  { %v2761_v40 = vpop.permute.xlu2 %791 }
 0x21d   :  { %v2753_v9 = vpop.permute.xlu0 %816 }
 0x220   :  { %1022 = vmatmul.bf16.gmra.mxu1 %v2230_v17  ;;  %v2781_v19 = vpop.permute.xlu1 %676 }
 0x222   :  { %948 = vmatmul.bf16.gmra.mxu0 %v2233_v43 }
 0x224   :  { %v2770_v10 = vpop.permute.xlu2 %696 }
 0x225   :  { %v2759_v26 = vpop.permute.xlu0 %716 }
 0x228   :  { %v2799_v57 = vpop.permute.xlu1 %756 }
 0x22c   :  { %v2779_v62 = vpop.permute.xlu2 %776 }
 0x22d   :  { %v2768_v23 = vpop.permute.xlu0 %796 }
 0x230   :  { %1027 = vmatmul.bf16.gmra.mxu1 %v2231_v3  ;;  %v662_v32 = vpop.permute.xlu1 %661 }
 0x232   :  { %953 = vmatmul.bf16.gmra.mxu0 %v2234_v24 }
 0x234   :  { %v2797_v39 = vpop.permute.xlu2 %681 }
 0x235   :  { %v2774_v60 = vpop.permute.xlu0 %701 }
 0x23c   :  { %v2809_v46 = vpop.permute.xlu2 %761 }
 0x23d   :  { %v2786_v34 = vpop.permute.xlu0 %781 }
 0x240   :  { %1032 = vmatmul.bf16.gmra.mxu1 %v2232_v59 }
 0x242   :  { %958 = vmatmul.bf16.gmra.mxu0 %v2235_v16 }
 0x244   :  { %v667_v11 = vpop.permute.xlu2 %666 }
 0x245   :  { %v2806_v63 = vpop.permute.xlu0 %686 }
 0x24d   :  { %v2811_v17 = vpop.permute.xlu0 %766 }
 0x24f   :  { %v924_v27 = vpop.f32.mrf.mxu0 }
 0x250   :  { %1037 = vmatmul.bf16.gmra.mxu1 %v2233_v43  ;;  %v925_v30 = vadd.f32 %v924_v27, %v662_v32 }
 0x252   :  { %963 = vmatmul.bf16.gmra.mxu0 %v2236_v20  ;;  %v1093_v38 = vmax.f32 %v925_v30, 0.0 }
 0x254   :  { %v1398_v7 = vmul.f32 %v2814_v55, %v1093_v38 }
 0x255   :  { %v672_v56 = vpop.permute.xlu0 %671 }
 0x257   :  { %v926_v47 = vpop.f32.mrf.mxu0 }
 0x258   :  { %v927_v8 = vadd.f32 %v926_v47, %v667_v11 }
 0x25a   :  { %v1095_v22 = vmax.f32 %v927_v8, 0.0 }
 0x25c   :  { %v1400_v27 = vmul.f32 %v2814_v55, %v1095_v22  ;;  %v2847_v22 = vld [vmem:[%s3323_s3 + $0x68] sm:$0xff] }
 0x25f   :  { %v929_v49 = vpop.f32.mrf.mxu0 }
 0x260   :  { %1042 = vmatmul.bf16.gmra.mxu1 %v2234_v24  ;;  %v930_v24 = vadd.f32 %v929_v49, %v672_v56 }
 0x262   :  { %968 = vmatmul.bf16.gmra.mxu0 %v2237_v29  ;;  %v1097_v0 = vmax.f32 %v930_v24, 0.0 }
 0x267   :  { %v931_v21 = vpop.f32.mrf.mxu0 }
 0x268   :  { %v2789_v37 = vadd.f32 %v931_v21, %v2781_v19 }
 0x26a   :  { %v1099_v38 = vmax.f32 %v2789_v37, 0.0 }
 0x26c   :  { %v1404_v8 = vmul.f32 %v2814_v55, %v1099_v38  ;;  %v2862_v38 = vld [vmem:[%s3323_s3 + $0x70] sm:$0xff] }
 0x26f   :  { %v934_v50 = vpop.f32.mrf.mxu0 }
 0x270   :  { %1047 = vmatmul.bf16.gmra.mxu1 %v2235_v16 }
 0x272   :  { %973 = vmatmul.bf16.gmra.mxu0 %v2804_v58 }
 0x277   :  { %v936_v25 = vpop.f32.mrf.mxu0 }
 0x27d   :  { %v1013_v48 = vpop.f32.mrf.mxu1 }
 0x27e   :  { %v1014_v14 = vadd.f32 %v1013_v48, %v662_v32  ;;  %v1402_v32 = vmul.f32 %v2814_v55, %v1097_v0 }
 0x27f   :  { %v939_v53 = vpop.f32.mrf.mxu0 }
 0x280   :  { %v1094_v52 = vmax.f32 %v1014_v14, 0.0  ;;  %1052 = vmatmul.bf16.gmra.mxu1 %v2236_v20 }
 0x282   :  { %v1399_v2 = vmul.f32 0.0, %v1094_v52  ;;  %978 = vmatmul.bf16.gmra.mxu0 %v2819_v5 }
 0x284   :  { %v2823_v36 = vadd.f32 %v1399_v2, %v1398_v7 }
 0x285   :  { %v1015_v54 = vpop.f32.mrf.mxu1 }
 0x286   :  { %v1016_v3 = vadd.f32 %v1015_v54, %v667_v11  ;;  %v935_v11 = vadd.f32 %v934_v50, %v2797_v39  ;;  %v937_v50 = vadd.f32 %v936_v25, %v2806_v63 }
 0x287   :  { %v941_v59 = vpop.f32.mrf.mxu0 }
 0x288   :  { %v1096_v43 = vmax.f32 %v1016_v3, 0.0 }
 0x28a   :  { %v1401_v16 = vmul.f32 0.0, %v1096_v43 }
 0x28c   :  { %v2826_v20 = vadd.f32 %v1401_v16, %v1400_v27 }
 0x28d   :  { %v1018_v21 = vpop.f32.mrf.mxu1 }
 0x28e   :  { %v1019_v47 = vadd.f32 %v1018_v21, %v672_v56  ;;  %v940_v21 = vadd.f32 %v939_v53, %v2763_v6  ;;  %v942_v53 = vadd.f32 %v941_v59, %v2770_v10 }
 0x28f   :  { %v944_v41 = vpop.f32.mrf.mxu0 }
 0x290   :  { %v1098_v4 = vmax.f32 %v1019_v47, 0.0  ;;  %1057 = vmatmul.bf16.gmra.mxu1 %v2237_v29  ;;  %v1101_v29 = vmax.f32 %v935_v11, 0.0 }
 0x292   :  { %v1403_v35 = vmul.f32 0.0, %v1098_v4  ;;  %983 = vmatmul.bf16.gmra.mxu0 %v2831_v28 }
 0x294   :  { %v2835_v49 = vadd.f32 %v1403_v35, %v1402_v32  ;;  %v1105_v35 = vmax.f32 %v940_v21, 0.0 }
 0x295   :  { %v1020_v30 = vpop.f32.mrf.mxu1 }
 0x296   :  { %v1021_v48 = vadd.f32 %v1020_v30, %v2781_v19  ;;  %v1406_v19 = vmul.f32 %v2814_v55, %v1101_v29 }
 0x297   :  { %v946_v14 = vpop.f32.mrf.mxu0 }
 0x298   :  { %v1100_v52 = vmax.f32 %v1021_v48, 0.0 }
 0x29a   :  { %v1405_v7 = vmul.f32 0.0, %v1100_v52 }
 0x29c   :  { %v2841_v2 = vadd.f32 %v1405_v7, %v1404_v8 }
 0x29d   :  { %v1023_v54 = vpop.f32.mrf.mxu1 }
 0x29e   :  { %v1024_v56 = vadd.f32 %v1023_v54, %v2797_v39  ;;  %v1103_v39 = vmax.f32 %v937_v50, 0.0 }
 0x29f   :  { %v949_v37 = vpop.f32.mrf.mxu0 }
 0x2a0   :  { %v1102_v3 = vmax.f32 %v1024_v56, 0.0  ;;  %1062 = vmatmul.bf16.gmra.mxu1 %v2804_v58  ;;  %v1408_v32 = vmul.f32 %v2814_v55, %v1103_v39  ;;  %v945_v56 = vadd.f32 %v944_v41, %v2774_v60  ;;  %v2875_v39 = vld [vmem:[%s3323_s3 + $0x78] sm:$0xff]  ;;  %v947_v41 = vadd.f32 %v946_v14, %v2748_v51 }
 0x2a2   :  { %v1407_v43 = vmul.f32 0.0, %v1102_v3  ;;  %988 = vmatmul.bf16.gmra.mxu0 %v2847_v22 }
 0x2a4   :  { %v2853_v24 = vadd.f32 %v1407_v43, %v1406_v19  ;;  %v1109_v43 = vmax.f32 %v945_v56, 0.0 }
 0x2a5   :  { %v1025_v16 = vpop.f32.mrf.mxu1 }
 0x2a6   :  { %v1026_v27 = vadd.f32 %v1025_v16, %v2806_v63  ;;  %v1410_v63 = vmul.f32 %v2814_v55, %v1105_v35 }
 0x2a7   :  { %v951_v0 = vpop.f32.mrf.mxu0 }
 0x2a8   :  { %v1104_v47 = vmax.f32 %v1026_v27, 0.0  ;;  %v1414_v27 = vmul.f32 %v2814_v55, %v1109_v43 }
 0x2aa   :  { %v1409_v4 = vmul.f32 0.0, %v1104_v47 }
 0x2ac   :  { %v1477_v58 = vadd.f32 %v1409_v4, %v1408_v32 }
 0x2ad   :  { %v1028_v30 = vpop.f32.mrf.mxu1 }
 0x2ae   :  { %v1029_v25 = vadd.f32 %v1028_v30, %v2763_v6  ;;  %1478 = vadd.xlane.f32.xlu1 %v1477_v58  ;;  %v1107_v6 = vmax.f32 %v942_v53, 0.0  ;;  %v950_v30 = vadd.f32 %v949_v37, %v2755_v1 }
 0x2af   :  { %v954_v48 = vpop.f32.mrf.mxu0 }
 0x2b0   :  { %v1106_v11 = vmax.f32 %v1029_v25, 0.0  ;;  %1067 = vmatmul.bf16.gmra.mxu1 %v2819_v5  ;;  %v1412_v50 = vmul.f32 %v2814_v55, %v1107_v6  ;;  %v1113_v53 = vmax.f32 %v950_v30, 0.0 }
 0x2b2   :  { %v1411_v52 = vmul.f32 0.0, %v1106_v11  ;;  %993 = vmatmul.bf16.gmra.mxu0 %v2862_v38 }
 0x2b4   :  { %v1480_v7 = vadd.f32 %v1411_v52, %v1410_v63 }
 0x2b5   :  { %v1030_v8 = vpop.f32.mrf.mxu1 }
 0x2b6   :  { %v1031_v29 = vadd.f32 %v1030_v8, %v2770_v10  ;;  %1481 = vadd.xlane.f32.xlu2 %v1480_v7  ;;  %v1418_v8 = vmul.f32 %v2814_v55, %v1113_v53 }
 0x2b7   :  { %v956_v54 = vpop.f32.mrf.mxu0 }
 0x2b8   :  { %v1108_v19 = vmax.f32 %v1031_v29, 0.0 }
 0x2ba   :  { %v1413_v3 = vmul.f32 0.0, %v1108_v19 }
 0x2bc   :  { %v1483_v5 = vadd.f32 %v1413_v3, %v1412_v50 }
 0x2bd   :  { %v1033_v16 = vpop.f32.mrf.mxu1 }
 0x2be   :  { %v1034_v59 = vadd.f32 %v1033_v16, %v2774_v60  ;;  %1484 = vadd.xlane.f32.xlu0 %v1483_v5  ;;  %v1111_v60 = vmax.f32 %v947_v41, 0.0  ;;  %v2894_v41 = vpop.permute.xlu0 %751 }
 0x2bf   :  { %v959_v10 = vpop.f32.mrf.mxu0 }
 0x2c0   :  { %v1110_v21 = vmax.f32 %v1034_v59, 0.0  ;;  %1072 = vmatmul.bf16.gmra.mxu1 %v2831_v28  ;;  %v1416_v63 = vmul.f32 %v2814_v55, %v1111_v60 }
 0x2c2   :  { %v1415_v47 = vmul.f32 0.0, %v1110_v21  ;;  %998 = vmatmul.bf16.gmra.mxu0 %v2875_v39 }
 0x2c4   :  { %v1486_v4 = vadd.f32 %v1415_v47, %v1414_v27 }
 0x2c5   :  { %v1035_v32 = vpop.f32.mrf.mxu1 }
 0x2c6   :  { %v1036_v35 = vadd.f32 %v1035_v32, %v2748_v51  ;;  %1487 = vadd.xlane.f32.xlu1 %v1486_v4  ;;  %v952_v51 = vadd.f32 %v951_v0, %v2759_v26  ;;  %v957_v4 = vadd.f32 %v956_v54, %v2730_v18 }
 0x2c7   :  { %v961_v58 = vpop.f32.mrf.mxu0 }
 0x2c8   :  { %v1112_v25 = vmax.f32 %v1036_v35, 0.0  ;;  %v1115_v19 = vmax.f32 %v952_v51, 0.0  ;;  %v1119_v30 = vmax.f32 %v957_v4, 0.0 }
 0x2ca   :  { %v1417_v11 = vmul.f32 0.0, %v1112_v25  ;;  %v1420_v5 = vmul.f32 %v2814_v55, %v1115_v19  ;;  %v960_v25 = vadd.f32 %v959_v10, %v2735_v44 }
 0x2cc   :  { %v1489_v28 = vadd.f32 %v1417_v11, %v1416_v63  ;;  %v1424_v11 = vmul.f32 %v2814_v55, %v1119_v30 }
 0x2cd   :  { %v1038_v52 = vpop.f32.mrf.mxu1 }
 0x2ce   :  { %v1039_v14 = vadd.f32 %v1038_v52, %v2755_v1  ;;  %1490 = vadd.xlane.f32.xlu2 %v1489_v28  ;;  %v955_v1 = vadd.f32 %v954_v48, %v2737_v15  ;;  %v1121_v28 = vmax.f32 %v960_v25, 0.0 }
 0x2cf   :  { %v964_v7 = vpop.f32.mrf.mxu0 }
 0x2d0   :  { %v1114_v6 = vmax.f32 %v1039_v14, 0.0  ;;  %1077 = vmatmul.bf16.gmra.mxu1 %v2847_v22  ;;  %v1117_v59 = vmax.f32 %v955_v1, 0.0  ;;  %v1426_v54 = vmul.f32 %v2814_v55, %v1121_v28 }
 0x2d2   :  { %v1419_v29 = vmul.f32 0.0, %v1114_v6 }
 0x2d4   :  { %v1492_v37 = vadd.f32 %v1419_v29, %v1418_v8  ;;  %v742_v29 = vpop.permute.xlu0 %741 }
 0x2d5   :  { %v1040_v56 = vpop.f32.mrf.mxu1  ;;  %v965_v1 = vadd.f32 %v964_v7, %v742_v29 }
 0x2d6   :  { %v1041_v3 = vadd.f32 %v1040_v56, %v2759_v26  ;;  %1493 = vadd.xlane.f32.xlu0 %v1492_v37  ;;  %v1422_v26 = vmul.f32 %v2814_v55, %v1117_v59 }
 0x2d7   :  { %v2889_v50 = vpop.f32.mrf.mxu0 }
 0x2d8   :  { %v1116_v43 = vmax.f32 %v1041_v3, 0.0 }
 0x2da   :  { %v1421_v16 = vmul.f32 0.0, %v1116_v43 }
 0x2dc   :  { %v1495_v27 = vadd.f32 %v1421_v16, %v1420_v5  ;;  %v747_v5 = vpop.permute.xlu2 %746 }
 0x2dd   :  { %v1043_v22 = vpop.f32.mrf.mxu1 }
 0x2de   :  { %v1044_v0 = vadd.f32 %v1043_v22, %v2737_v15  ;;  %1496 = vadd.xlane.f32.xlu1 %v1495_v27  ;;  %v967_v22 = vadd.f32 %v2889_v50, %v747_v5 }
 0x2df   :  { %v969_v21 = vpop.f32.mrf.mxu0 }
 0x2e0   :  { %v1118_v47 = vmax.f32 %v1044_v0, 0.0  ;;  %1082 = vmatmul.bf16.gmra.mxu1 %v2862_v38  ;;  %v2899_v48 = vadd.f32 %v969_v21, %v2894_v41 }
 0x2e2   :  { %v1423_v32 = vmul.f32 0.0, %v1118_v47  ;;  %v1127_v47 = vmax.f32 %v967_v22, 0.0  ;;  %v1129_v30 = vmax.f32 %v2899_v48, 0.0 }
 0x2e4   :  { %v1498_v60 = vadd.f32 %v1423_v32, %v1422_v26  ;;  %v1434_v48 = vmul.f32 %v2814_v55, %v1129_v30  ;;  %v1373_v30 = vld [vmem:[#allocation2 + $0x38] sm:$0xff] }
 0x2e5   :  { %v1045_v35 = vpop.f32.mrf.mxu1 }
 0x2e6   :  { %v1046_v15 = vadd.f32 %v1045_v35, %v2730_v18  ;;  %1499 = vadd.xlane.f32.xlu2 %v1498_v60  ;;  %v962_v18 = vadd.f32 %v961_v58, %v2728_v61  ;;  %v1432_v60 = vmul.f32 %v2814_v55, %v1127_v47 }
 0x2e7   :  { %v971_v19 = vpop.f32.mrf.mxu0 }
 0x2e8   :  { %v1120_v63 = vmax.f32 %v1046_v15, 0.0  ;;  %v1123_v37 = vmax.f32 %v962_v18, 0.0 }
 0x2ea   :  { %v1425_v53 = vmul.f32 0.0, %v1120_v63 }
 0x2ec   :  { %v1501_v38 = vadd.f32 %v1425_v53, %v1424_v11  ;;  %v972_v53 = vadd.f32 %v971_v19, %v2799_v57  ;;  %v1371_v19 = vld [vmem:[#allocation2 + $0x28] sm:$0xff] }
 0x2ed   :  { %v1048_v52 = vpop.f32.mrf.mxu1 }
 0x2ee   :  { %v1049_v14 = vadd.f32 %v1048_v52, %v2735_v44  ;;  %1502 = vadd.xlane.f32.xlu2 %v1501_v38  ;;  %v1428_v44 = vmul.f32 %v2814_v55, %v1123_v37 }
 0x2ef   :  { %v974_v27 = vpop.f32.mrf.mxu0 }
 0x2f0   :  { %v1122_v8 = vmax.f32 %v1049_v14, 0.0  ;;  %1087 = vmatmul.bf16.gmra.mxu1 %v2875_v39  ;;  %v1125_v39 = vmax.f32 %v965_v1, 0.0  ;;  %v1131_v14 = vmax.f32 %v972_v53, 0.0 }
 0x2f2   :  { %v1427_v6 = vmul.f32 0.0, %v1122_v8  ;;  %v1430_v59 = vmul.f32 %v2814_v55, %v1125_v39  ;;  %v975_v8 = vadd.f32 %v974_v27, %v2809_v46 }
 0x2f4   :  { %v1504_v51 = vadd.f32 %v1427_v6, %v1426_v54  ;;  %v1436_v6 = vmul.f32 %v2814_v55, %v1131_v14 }
 0x2f5   :  { %v1050_v10 = vpop.f32.mrf.mxu1 }
 0x2f6   :  { %v1051_v56 = vadd.f32 %v1050_v10, %v2728_v61  ;;  %1505 = vadd.xlane.f32.xlu2 %v1504_v51  ;;  %v1133_v10 = vmax.f32 %v975_v8, 0.0  ;;  %v1374_v8 = vld [vmem:[#allocation2 + $0x40] sm:$0xff] }
 0x2f7   :  { %v976_v35 = vpop.f32.mrf.mxu0 }
 0x2f8   :  { %v1124_v3 = vmax.f32 %v1051_v56, 0.0 }
 0x2fa   :  { %v1429_v43 = vmul.f32 0.0, %v1124_v3  ;;  %v1438_v3 = vmul.f32 %v2814_v55, %v1133_v10 }
 0x2fc   :  { %v1507_v58 = vadd.f32 %v1429_v43, %v1428_v44  ;;  %v977_v43 = vadd.f32 %v976_v35, %v2811_v17 }
 0x2fd   :  { %v1053_v61 = vpop.f32.mrf.mxu1 }
 0x2fe   :  { %v1054_v7 = vadd.f32 %v1053_v61, %v742_v29  ;;  %1508 = vadd.xlane.f32.xlu1 %v1507_v58 }
 0x2ff   :  { %v979_v38 = vpop.f32.mrf.mxu0 }
 0x300   :  { %v1126_v16 = vmax.f32 %v1054_v7, 0.0 }
 0x302   :  { %v1431_v0 = vmul.f32 0.0, %v1126_v16 }
 0x304   :  { %v2935_v21 = vadd.f32 %v1431_v0, %v1430_v59  ;;  %v1372_v59 = vld [vmem:[#allocation2 + $0x30] sm:$0xff] }
 0x305   :  { %v1055_v26 = vpop.f32.mrf.mxu1 }
 0x306   :  { %v1056_v4 = vadd.f32 %v1055_v26, %v747_v5  ;;  %v1135_v5 = vmax.f32 %v977_v43, 0.0  ;;  %v980_v26 = vadd.f32 %v979_v38, %v2772_v42 }
 0x307   :  { %v981_v56 = vpop.f32.mrf.mxu0 }
 0x308   :  { %v1128_v50 = vmax.f32 %v1056_v4, 0.0  ;;  %v1440_v0 = vmul.f32 %v2814_v55, %v1135_v5 }
 0x30a   :  { %v1433_v32 = vmul.f32 0.0, %v1128_v50 }
 0x30c   :  { %v2955_v15 = vadd.f32 %v1433_v32, %v1432_v60  ;;  %v1137_v60 = vmax.f32 %v980_v26, 0.0 }
 0x30d   :  { %v1058_v25 = vpop.f32.mrf.mxu1 }
 0x30e   :  { %v1059_v63 = vadd.f32 %v1058_v25, %v2894_v41 }
 0x30f   :  { %v984_v27 = vpop.f32.mrf.mxu0 }
 0x310   :  { %v1130_v11 = vmax.f32 %v1059_v63, 0.0  ;;  %v1442_v63 = vmul.f32 %v2814_v55, %v1137_v60 }
 0x312   :  { %v1435_v28 = vmul.f32 0.0, %v1130_v11  ;;  %v982_v11 = vadd.f32 %v981_v56, %v2779_v62 }
 0x314   :  { %v2976_v41 = vadd.f32 %v1435_v28, %v1434_v48  ;;  %v1139_v14 = vmax.f32 %v982_v11, 0.0 }
 0x315   :  { %v1060_v52 = vpop.f32.mrf.mxu1 }
 0x316   :  { %v1061_v54 = vadd.f32 %v1060_v52, %v2799_v57 }
 0x317   :  { %v986_v28 = vpop.f32.mrf.mxu0 }
 0x318   :  { %v1132_v18 = vmax.f32 %v1061_v54, 0.0 }
 0x31a   :  { %v1437_v51 = vmul.f32 0.0, %v1132_v18 }
 0x31c   :  { %v2991_v57 = vadd.f32 %v1437_v51, %v1436_v6  ;;  %v1444_v6 = vmul.f32 %v2814_v55, %v1139_v14  ;;  %v985_v51 = vadd.f32 %v984_v27, %v2786_v34 }
 0x31d   :  { %v1063_v29 = vpop.f32.mrf.mxu1 }
 0x31e   :  { %v1064_v37 = vadd.f32 %v1063_v29, %v2809_v46 }
 0x31f   :  { %v989_v56 = vpop.f32.mrf.mxu0 }
 0x320   :  { %v1134_v1 = vmax.f32 %v1064_v37, 0.0 }
 0x321   :  { %v1479_v44 = vpop.xlane.xlu1 %1478 }
 0x322   :  { %v1439_v39 = vmul.f32 0.0, %v1134_v1  ;;  %v1563_v58 = vadd.f32 %v1479_v44, %v1371_v19 }
 0x324   :  { %1596 = vst.msk [vmem:[#allocation2 + $0x28] sm:$0xff] %vm50_vm4, %v1563_v58  ;;  %v2997_v61 = vadd.f32 %v1439_v39, %v1438_v3  ;;  %v1141_v3 = vmax.f32 %v985_v51, 0.0  ;;  %v987_v58 = vadd.f32 %v986_v28, %v2757_v31 }
 0x325   :  { %v1065_v7 = vpop.f32.mrf.mxu1 }
 0x326   :  { %v1066_v16 = vadd.f32 %v1065_v7, %v2811_v17  ;;  %v1446_v39 = vmul.f32 %v2814_v55, %v1141_v3 }
 0x328   :  { %v1136_v46 = vmax.f32 %v1066_v16, 0.0 }
 0x329   :  { %v1482_v22 = vpop.xlane.xlu2 %1481 }
 0x32a   :  { %v1441_v47 = vmul.f32 0.0, %v1136_v46  ;;  %v1564_v4 = vadd.f32 %v1482_v22, %v1372_v59  ;;  %v1143_v46 = vmax.f32 %v987_v58, 0.0  ;;  %v991_v22 = vpop.f32.mrf.mxu0 }
 0x32b   :  { %v992_v28 = vadd.f32 %v991_v22, %v2768_v23 }
 0x32c   :  { %1597 = vst.msk [vmem:[#allocation2 + $0x30] sm:$0xff] %vm50_vm4, %v1564_v4  ;;  %v3003_v50 = vadd.f32 %v1441_v47, %v1440_v0  ;;  %v1448_v47 = vmul.f32 %v2814_v55, %v1143_v46  ;;  %v990_v4 = vadd.f32 %v989_v56, %v2761_v40 }
 0x32d   :  { %v1068_v32 = vpop.f32.mrf.mxu1 }
 0x32e   :  { %v1069_v35 = vadd.f32 %v1068_v32, %v2772_v42 }
 0x330   :  { %v1138_v17 = vmax.f32 %v1069_v35, 0.0 }
 0x331   :  { %v1485_v25 = vpop.xlane.xlu0 %1484 }
 0x332   :  { %v1443_v48 = vmul.f32 0.0, %v1138_v17  ;;  %v1565_v53 = vadd.f32 %v1485_v25, %v1373_v30  ;;  %v1145_v17 = vmax.f32 %v990_v4, 0.0  ;;  %v994_v11 = vpop.f32.mrf.mxu0 }
 0x334   :  { %1598 = vst.msk [vmem:[#allocation2 + $0x38] sm:$0xff] %vm50_vm4, %v1565_v53  ;;  %v1528_v38 = vadd.f32 %v1443_v48, %v1442_v63  ;;  %v1450_v53 = vmul.f32 %v2814_v55, %v1145_v17 }
 0x335   :  { %v1070_v52 = vpop.f32.mrf.mxu1 }
 0x336   :  { %v1071_v54 = vadd.f32 %v1070_v52, %v2779_v62  ;;  %1529 = vadd.xlane.f32.xlu2 %v1528_v38  ;;  %v1375_v62 = vld [vmem:[#allocation2 + $0x48] sm:$0xff] }
 0x338   :  { %v1140_v42 = vmax.f32 %v1071_v54, 0.0 }
 0x339   :  { %v1488_v18 = vpop.xlane.xlu1 %1487 }
 0x33a   :  { %v1445_v10 = vmul.f32 0.0, %v1140_v42  ;;  %v1566_v29 = vadd.f32 %v1488_v18, %v1374_v8  ;;  %v1147_v8 = vmax.f32 %v992_v28, 0.0  ;;  %v996_v56 = vpop.f32.mrf.mxu0 }
 0x33b   :  { %v997_v58 = vadd.f32 %v996_v56, %v2746_v45 }
 0x33c   :  { %1599 = vst.msk [vmem:[#allocation2 + $0x40] sm:$0xff] %vm50_vm4, %v1566_v29  ;;  %v1531_v37 = vadd.f32 %v1445_v10, %v1444_v6  ;;  %v1452_v51 = vmul.f32 %v2814_v55, %v1147_v8  ;;  %v995_v10 = vadd.f32 %v994_v11, %v2744_v12 }
 0x33d   :  { %v1073_v19 = vpop.f32.mrf.mxu1 }
 0x33e   :  { %v1074_v1 = vadd.f32 %v1073_v19, %v2786_v34  ;;  %1532 = vadd.xlane.f32.xlu0 %v1531_v37  ;;  %v1376_v34 = vld [vmem:[#allocation2 + $0x50] sm:$0xff] }
 0x340   :  { %v1142_v44 = vmax.f32 %v1074_v1, 0.0  ;;  %v1149_v1 = vmax.f32 %v995_v10, 0.0 }
 0x341   :  { %v1491_v43 = vpop.xlane.xlu2 %1490 }
 0x342   :  { %v1447_v7 = vmul.f32 0.0, %v1142_v44  ;;  %v1567_v5 = vadd.f32 %v1491_v43, %v1375_v62 }
 0x344   :  { %1600 = vst.msk [vmem:[#allocation2 + $0x48] sm:$0xff] %vm50_vm4, %v1567_v5  ;;  %v1534_v16 = vadd.f32 %v1447_v7, %v1446_v39  ;;  %v1454_v39 = vmul.f32 %v2814_v55, %v1149_v1  ;;  %v1630_v1 = vld [vmem:[#allocation2 + $0x38] sm:$0xff] }
 0x345   :  { %v1075_v59 = vpop.f32.mrf.mxu1 }
 0x346   :  { %v1076_v27 = vadd.f32 %v1075_v59, %v2757_v31  ;;  %1535 = vadd.xlane.f32.xlu1 %v1534_v16  ;;  %v1377_v31 = vld [vmem:[#allocation2 + $0x58] sm:$0xff]  ;;  %v999_v59 = vpop.f32.mrf.mxu0 }
 0x348   :  { %v1144_v0 = vmax.f32 %v1076_v27, 0.0  ;;  %v1151_v27 = vmax.f32 %v997_v58, 0.0 }
 0x349   :  { %v1494_v26 = vpop.xlane.xlu0 %1493 }
 0x34a   :  { %v1449_v32 = vmul.f32 0.0, %v1144_v0  ;;  %v1568_v60 = vadd.f32 %v1494_v26, %v1376_v34  ;;  %v1456_v26 = vmul.f32 %v2814_v55, %v1151_v27 }
 0x34c   :  { %1601 = vst.msk [vmem:[#allocation2 + $0x50] sm:$0xff] %vm50_vm4, %v1568_v60  ;;  %v1537_v35 = vadd.f32 %v1449_v32, %v1448_v47  ;;  %v1000_v47 = vadd.f32 %v999_v59, %v2742_v33 }
 0x34d   :  { %v1078_v30 = vpop.f32.mrf.mxu1 }
 0x34e   :  { %v1079_v25 = vadd.f32 %v1078_v30, %v2761_v40  ;;  %1538 = vadd.xlane.f32.xlu2 %v1537_v35  ;;  %v1378_v40 = vld [vmem:[#allocation2 + $0x60] sm:$0xff]  ;;  %v1153_v30 = vmax.f32 %v1000_v47, 0.0 }
 0x34f   :  { %v1394_v47 = vld [vmem:[#allocation2 + $0xe0] sm:$0xff] }
 0x350   :  { %v1146_v63 = vmax.f32 %v1079_v25, 0.0  ;;  %v1381_v25 = vld [vmem:[#allocation2 + $0x78] sm:$0xff]  ;;  %v1458_v11 = vmul.f32 %v2814_v55, %v1153_v30 }
 0x351   :  { %v1497_v48 = vpop.xlane.xlu1 %1496 }
 0x352   :  { %v1451_v38 = vmul.f32 0.0, %v1146_v63  ;;  %v1569_v52 = vadd.f32 %v1497_v48, %v1377_v31 }
 0x354   :  { %1602 = vst.msk [vmem:[#allocation2 + $0x58] sm:$0xff] %vm50_vm4, %v1569_v52  ;;  %v1540_v14 = vadd.f32 %v1451_v38, %v1450_v53 }
 0x355   :  { %v1080_v54 = vpop.f32.mrf.mxu1 }
 0x356   :  { %v1081_v42 = vadd.f32 %v1080_v54, %v2768_v23  ;;  %1541 = vadd.xlane.f32.xlu0 %v1540_v14  ;;  %v1379_v23 = vld [vmem:[#allocation2 + $0x68] sm:$0xff] }
 0x358   :  { %v1148_v18 = vmax.f32 %v1081_v42, 0.0 }
 0x359   :  { %v1500_v6 = vpop.xlane.xlu2 %1499 }
 0x35a   :  { %v1453_v29 = vmul.f32 0.0, %v1148_v18  ;;  %v1570_v37 = vadd.f32 %v1500_v6, %v1378_v40 }
 0x35c   :  { %1603 = vst.msk [vmem:[#allocation2 + $0x60] sm:$0xff] %vm50_vm4, %v1570_v37  ;;  %v1543_v19 = vadd.f32 %v1453_v29, %v1452_v51 }
 0x35d   :  { %v1083_v3 = vpop.f32.mrf.mxu1 }
 0x35e   :  { %v1084_v62 = vadd.f32 %v1083_v3, %v2744_v12  ;;  %1544 = vadd.xlane.f32.xlu1 %v1543_v19  ;;  %v1380_v12 = vld [vmem:[#allocation2 + $0x70] sm:$0xff]  ;;  %v1632_v19 = vld [vmem:[#allocation2 + $0x48] sm:$0xff]  ;;  %v1631_v3 = vld [vmem:[#allocation2 + $0x40] sm:$0xff] }
 0x360   :  { %v1150_v44 = vmax.f32 %v1084_v62, 0.0  ;;  %v1663_v62 = vmul.f32 0.0625, %v1631_v3 }
 0x361   :  { %v1503_v43 = vpop.xlane.xlu2 %1502 }
 0x362   :  { %v1455_v7 = vmul.f32 0.0, %v1150_v44  ;;  %v1571_v5 = vadd.f32 %v1503_v43, %v1379_v23  ;;  %v1629_v23 = vld [vmem:[#allocation2 + $0x30] sm:$0xff]  ;;  %v1662_v44 = vmul.f32 0.0625, %v1630_v1  ;;  %v1628_v43 = vld [vmem:[#allocation2 + $0x28] sm:$0xff] }
 0x364   :  { %1604 = vst.msk [vmem:[#allocation2 + $0x68] sm:$0xff] %vm50_vm4, %v1571_v5  ;;  %v1546_v16 = vadd.f32 %v1455_v7, %v1454_v39  ;;  %v1388_v39 = vld [vmem:[#allocation2 + $0xb0] sm:$0xff] }
 0x365   :  { %v1085_v46 = vpop.f32.mrf.mxu1 }
 0x366   :  { %v1086_v22 = vadd.f32 %v1085_v46, %v2746_v45  ;;  %1547 = vadd.xlane.f32.xlu2 %v1546_v16  ;;  %v1001_v45 = vpop.f32.mrf.mxu0  ;;  %v1390_v16 = vld [vmem:[#allocation2 + $0xc0] sm:$0xff] }
 0x367   :  { %v1002_v48 = vadd.f32 %v1001_v45, %v2753_v9 }
 0x368   :  { %v1152_v34 = vmax.f32 %v1086_v22, 0.0 }
 0x369   :  { %v1506_v0 = vpop.xlane.xlu2 %1505  ;;  %v1155_v14 = vmax.f32 %v1002_v48, 0.0 }
 0x36a   :  { %v1457_v4 = vmul.f32 0.0, %v1152_v34  ;;  %v1572_v32 = vadd.f32 %v1506_v0, %v1380_v12  ;;  %v1393_v34 = vld [vmem:[#allocation2 + $0xd8] sm:$0xff] }
 0x36b   :  { %v1460_v54 = vmul.f32 %v2814_v55, %v1155_v14  ;;  %v1636_v51 = vld [vmem:[#allocation2 + $0x68] sm:$0xff]  ;;  %v1633_v55 = vld [vmem:[#allocation2 + $0x50] sm:$0xff]  ;;  %v1397_v14 = vld [vmem:[#allocation2 + $0xf8] sm:$0xff] }
 0x36c   :  { %1605 = vst.msk [vmem:[#allocation2 + $0x70] sm:$0xff] %vm50_vm4, %v1572_v32  ;;  %v1549_v60 = vadd.f32 %v1457_v4, %v1456_v26  ;;  %v1668_v29 = vmul.f32 0.0625, %v1636_v51  ;;  %v1370_v51 = vld [vmem:[#allocation2 + $0x20] sm:$0xff] }
 0x36d   :  { %v1088_v35 = vpop.f32.mrf.mxu1 }
 0x36e   :  { %v1089_v17 = vadd.f32 %v1088_v35, %v2742_v33  ;;  %1550 = vadd.xlane.f32.xlu0 %v1549_v60  ;;  %1472 = vadd.xlane.f32.xlu2 %v2841_v2  ;;  %v1395_v60 = vld [vmem:[#allocation2 + $0xe8] sm:$0xff]  ;;  %v1369_v35 = vld [vmem:[#allocation2 + $0x18] sm:$0xff] }
 0x370   :  { %v1154_v31 = vmax.f32 %v1089_v17, 0.0 }
 0x371   :  { %v1509_v63 = vpop.xlane.xlu1 %1508 }
 0x372   :  { %v1459_v53 = vmul.f32 0.0, %v1154_v31  ;;  %v1573_v28 = vadd.f32 %v1509_v63, %v1381_v25  ;;  %v1733_v31 = vld [vmem:[%s3327_s7 + $0x70] sm:$0xff]  ;;  %v1396_v63 = vld [vmem:[#allocation2 + $0xf0] sm:$0xff] }
 0x373   :  { %v1637_v6 = vld [vmem:[#allocation2 + $0x70] sm:$0xff] }
 0x374   :  { %1606 = vst.msk [vmem:[#allocation2 + $0x78] sm:$0xff] %vm50_vm4, %v1573_v28  ;;  %v1552_v38 = vadd.f32 %v1459_v53, %v1458_v11  ;;  %v1669_v10 = vmul.f32 0.0625, %v1637_v6  ;;  %v1385_v11 = vld [vmem:[#allocation2 + $0x98] sm:$0xff] }
 0x375   :  { %v1090_v52 = vpop.f32.mrf.mxu1 }
 0x376   :  { %v1091_v33 = vadd.f32 %v1090_v52, %v2753_v9  ;;  %1553 = vadd.xlane.f32.xlu1 %v1552_v38  ;;  %1520 = vadd.xlane.f32.xlu2 %v2991_v57  ;;  %v1635_v9 = vld [vmem:[#allocation2 + $0x60] sm:$0xff]  ;;  %v1634_v57 = vld [vmem:[#allocation2 + $0x58] sm:$0xff] }
 0x377   :  { %v1667_v37 = vmul.f32 0.0625, %v1635_v9  ;;  %v1666_v56 = vmul.f32 0.0625, %v1634_v57  ;;  %v1731_v52 = vld [vmem:[%s3327_s7 + $0x60] sm:$0xff]  ;;  %v1732_v9 = vld [vmem:[%s3327_s7 + $0x68] sm:$0xff] }
 0x378   :  { %v1156_v2 = vmax.f32 %v1091_v33, 0.0  ;;  %v1387_v33 = vld [vmem:[#allocation2 + $0xa8] sm:$0xff] }
 0x37a   :  { %v1461_v8 = vmul.f32 0.0, %v1156_v2  ;;  %v1366_v2 = vld [vmem:[#allocation2] sm:$0xff] }
 0x37b   :  { %v1638_v42 = vld [vmem:[#allocation2 + $0x78] sm:$0xff] }
 0x37c   :  { %v1555_v40 = vadd.f32 %v1461_v8, %v1460_v54  ;;  %v1670_v18 = vmul.f32 0.0625, %v1638_v42 }
 0x37e   :  { %1556 = vadd.xlane.f32.xlu0 %v1555_v40  ;;  %1526 = vadd.xlane.f32.xlu1 %v3003_v50  ;;  %v1665_v50 = vmul.f32 0.0625, %v1633_v55 }
 0x37f   :  { %1463 = vadd.xlane.f32.xlu2 %v2823_v36  ;;  %1799 = vmatpush.msrb.mxu2 %v1670_v18  ;;  %v1664_v36 = vmul.f32 0.0625, %v1632_v19 }
 0x381   :  { %1800 = vmatpush.msrb.mxu2 %v1669_v10  ;;  %v1368_v10 = vld [vmem:[#allocation2 + $0x10] sm:$0xff] }
 0x383   :  { %1801 = vmatpush.msrb.mxu2 %v1668_v29  ;;  %v1728_v29 = vld [vmem:[%s3327_s7 + $0x48] sm:$0xff] }
 0x385   :  { %1802 = vmatpush.msrb.mxu2 %v1667_v37 }
 0x386   :  { %1475 = vadd.xlane.f32.xlu0 %v2853_v24  ;;  %1469 = vadd.xlane.f32.xlu1 %v2835_v49  ;;  %v1661_v24 = vmul.f32 0.0625, %v1629_v23  ;;  %v1660_v49 = vmul.f32 0.0625, %v1628_v43  ;;  %v1725_v23 = vld [vmem:[%s3327_s7 + $0x30] sm:$0xff]  ;;  %v1384_v43 = vld [vmem:[#allocation2 + $0x90] sm:$0xff] }
 0x387   :  { %1803 = vmatpush.msrb.mxu2 %v1666_v56 }
 0x389   :  { %1804 = vmatpush.msrb.mxu2 %v1665_v50 }
 0x38b   :  { %1805 = vmatpush.msrb.mxu2 %v1664_v36 }
 0x38d   :  { %1806 = vmatpush.msrb.mxu2 %v1663_v62  ;;  %v1729_v62 = vld [vmem:[%s3327_s7 + $0x50] sm:$0xff] }
 0x38e   :  { %1523 = vadd.xlane.f32.xlu0 %v2997_v61  ;;  %1517 = vadd.xlane.f32.xlu1 %v2976_v41  ;;  %v1389_v61 = vld [vmem:[#allocation2 + $0xb8] sm:$0xff] }
 0x38f   :  { %1807 = vmatpush.msrb.mxu2 %v1662_v44  ;;  %v1386_v44 = vld [vmem:[#allocation2 + $0xa0] sm:$0xff] }
 0x391   :  { %1808 = vmatpush.msrb.mxu2 %v1661_v24 }
 0x393   :  { %1809 = vmatpush.msrb.mxu2 %v1660_v49 }
 0x396   :  { %1511 = vadd.xlane.f32.xlu1 %v2935_v21  ;;  %1466 = vadd.xlane.f32.xlu0 %v2826_v20  ;;  %v1391_v21 = vld [vmem:[#allocation2 + $0xc8] sm:$0xff] }
 0x39e   :  { %1514 = vadd.xlane.f32.xlu0 %v2955_v15  ;;  %v1392_v15 = vld [vmem:[#allocation2 + $0xd0] sm:$0xff] }
 0x3a9   :  { %v1530_v58 = vpop.xlane.xlu2 %1529 }
 0x3aa   :  { %v1580_v7 = vadd.f32 %v1530_v58, %v1388_v39 }
 0x3ac   :  { %1613 = vst.msk [vmem:[#allocation2 + $0xb0] sm:$0xff] %vm50_vm4, %v1580_v7 }
 0x3af   :  { %1777 = vrot.lane.b32.xlu1 %v1732_v9, %s2300_s30 }
 0x3b1   :  { %v1533_v5 = vpop.xlane.xlu0 %1532 }
 0x3b2   :  { %v1581_v41 = vadd.f32 %v1533_v5, %v1389_v61  ;;  %1779 = vrot.lane.b32.xlu0 %v1733_v31, %s2300_s30 }
 0x3b4   :  { %1614 = vst.msk [vmem:[#allocation2 + $0xb8] sm:$0xff] %vm50_vm4, %v1581_v41 }
 0x3b7   :  { %1771 = vrot.lane.b32.xlu1 %v1729_v62, %s2300_s30  ;;  %v1689_v62 = vld [vmem:[%s3324_s4 + $0x10] sm:$0xff] }
 0x3b9   :  { %v1536_v59 = vpop.xlane.xlu1 %1535 }
 0x3ba   :  { %v1582_v46 = vadd.f32 %v1536_v59, %v1390_v16  ;;  %1775 = vrot.lane.b32.xlu0 %v1731_v52, %s2300_s30  ;;  %v1383_v52 = vld [vmem:[#allocation2 + $0x88] sm:$0xff] }
 0x3bc   :  { %1615 = vst.msk [vmem:[#allocation2 + $0xc0] sm:$0xff] %vm50_vm4, %v1582_v46 }
 0x3c1   :  { %v1539_v27 = vpop.xlane.xlu2 %1538 }
 0x3c2   :  { %v1583_v20 = vadd.f32 %v1539_v27, %v1391_v21  ;;  %1769 = vrot.lane.b32.xlu0 %v1728_v29, %s2300_s30 }
 0x3c4   :  { %1616 = vst.msk [vmem:[#allocation2 + $0xc8] sm:$0xff] %vm50_vm4, %v1583_v20 }
 0x3c9   :  { %v1542_v22 = vpop.xlane.xlu0 %1541 }
 0x3ca   :  { %v1584_v12 = vadd.f32 %v1542_v22, %v1392_v15  ;;  %1763 = vrot.lane.b32.xlu0 %v1725_v23, %s2300_s30  ;;  %v1727_v23 = vld [vmem:[%s3327_s7 + $0x40] sm:$0xff] }
 0x3cb   :  { %v1648_v15 = vld [vmem:[#allocation2 + $0xc8] sm:$0xff] }
 0x3cc   :  { %1617 = vst.msk [vmem:[#allocation2 + $0xd0] sm:$0xff] %vm50_vm4, %v1584_v12 }
 0x3d1   :  { %v1545_v0 = vpop.xlane.xlu1 %1544 }
 0x3d2   :  { %v1585_v26 = vadd.f32 %v1545_v0, %v1393_v34  ;;  %v1726_v34 = vld [vmem:[%s3327_s7 + $0x38] sm:$0xff] }
 0x3d3   :  { %v1649_v46 = vld [vmem:[#allocation2 + $0xd0] sm:$0xff]  ;;  %1765 = vrot.lane.b32.xlu1 %v1726_v34, %s2300_s30  ;;  %v1707_v34 = vld [vmem:[%s3324_s4 + $0xa0] sm:$0xff] }
 0x3d4   :  { %1618 = vst.msk [vmem:[#allocation2 + $0xd8] sm:$0xff] %vm50_vm4, %v1585_v26  ;;  %v1681_v12 = vmul.f32 0.0625, %v1649_v46  ;;  %v1722_v0 = vld [vmem:[%s3327_s7 + $0x18] sm:$0xff]  ;;  %v1382_v26 = vld [vmem:[#allocation2 + $0x80] sm:$0xff] }
 0x3d5   :  { %1757 = vrot.lane.b32.xlu0 %v1722_v0, %s2300_s30  ;;  %v1700_v46 = vld [vmem:[%s3324_s4 + $0x68] sm:$0xff] }
 0x3d9   :  { %v1548_v4 = vpop.xlane.xlu2 %1547 }
 0x3da   :  { %v1586_v32 = vadd.f32 %v1548_v4, %v1394_v47  ;;  %v1367_v47 = vld [vmem:[#allocation2 + $0x8] sm:$0xff]  ;;  %v1647_v4 = vld [vmem:[#allocation2 + $0xc0] sm:$0xff] }
 0x3db   :  { %v1650_v7 = vld [vmem:[#allocation2 + $0xd8] sm:$0xff]  ;;  %v1679_v31 = vmul.f32 0.0625, %v1647_v4  ;;  %v1710_v4 = vld [vmem:[%s3324_s4 + $0xb8] sm:$0xff] }
 0x3dc   :  { %1619 = vst.msk [vmem:[#allocation2 + $0xe0] sm:$0xff] %vm50_vm4, %v1586_v32  ;;  %v1682_v27 = vmul.f32 0.0625, %v1650_v7  ;;  %v1694_v7 = vld [vmem:[%s3324_s4 + $0x38] sm:$0xff] }
 0x3e1   :  { %v1551_v30 = vpop.xlane.xlu0 %1550  ;;  %v1473_v17 = vpop.xlane.xlu2 %1472 }
 0x3e2   :  { %v1587_v45 = vadd.f32 %v1551_v30, %v1395_v60  ;;  %v1561_v25 = vadd.f32 %v1473_v17, %v1369_v35  ;;  %v1680_v60 = vmul.f32 0.0625, %v1648_v15  ;;  %v1646_v17 = vld [vmem:[#allocation2 + $0xb8] sm:$0xff]  ;;  %v1704_v15 = vld [vmem:[%s3324_s4 + $0x88] sm:$0xff] }
 0x3e3   :  { %v1651_v24 = vld [vmem:[#allocation2 + $0xe0] sm:$0xff] }
 0x3e4   :  { %1620 = vst.msk [vmem:[#allocation2 + $0xe8] sm:$0xff] %vm50_vm4, %v1587_v45  ;;  %v1683_v41 = vmul.f32 0.0625, %v1651_v24  ;;  %v1724_v24 = vld [vmem:[%s3327_s7 + $0x28] sm:$0xff] }
 0x3e5   :  { %1594 = vst.msk [vmem:[#allocation2 + $0x18] sm:$0xff] %vm50_vm4, %v1561_v25 }
 0x3e9   :  { %v1554_v48 = vpop.xlane.xlu1 %1553  ;;  %v1521_v53 = vpop.xlane.xlu2 %1520 }
 0x3ea   :  { %v1588_v28 = vadd.f32 %v1554_v48, %v1396_v63  ;;  %v1577_v38 = vadd.f32 %v1521_v53, %v1385_v11  ;;  %v1645_v63 = vld [vmem:[#allocation2 + $0xb0] sm:$0xff]  ;;  %v1678_v11 = vmul.f32 0.0625, %v1646_v17  ;;  %v1713_v17 = vld [vmem:[%s3324_s4 + $0xd0] sm:$0xff] }
 0x3eb   :  { %v1652_v36 = vld [vmem:[#allocation2 + $0xe8] sm:$0xff]  ;;  %v1677_v53 = vmul.f32 0.0625, %v1645_v63  ;;  %v1715_v63 = vld [vmem:[%s3324_s4 + $0xe0] sm:$0xff] }
 0x3ec   :  { %1621 = vst.msk [vmem:[#allocation2 + $0xf0] sm:$0xff] %vm50_vm4, %v1588_v28  ;;  %v1684_v49 = vmul.f32 0.0625, %v1652_v36  ;;  %v1626_v59 = vld [vmem:[#allocation2 + $0x18] sm:$0xff] }
 0x3ed   :  { %1610 = vst.msk [vmem:[#allocation2 + $0x98] sm:$0xff] %vm50_vm4, %v1577_v38  ;;  %v1658_v22 = vmul.f32 0.0625, %v1626_v59  ;;  %v1723_v28 = vld [vmem:[%s3327_s7 + $0x20] sm:$0xff] }
 0x3ee   :  { %v1719_v38 = vld [vmem:[%s3327_s7] sm:$0xff]  ;;  %1759 = vrot.lane.b32.xlu1 %v1723_v28, %s2300_s30  ;;  %v1717_v28 = vld [vmem:[%s3324_s4 + $0xf0] sm:$0xff] }
 0x3ef   :  { %1751 = vrot.lane.b32.xlu0 %v1719_v38, %s2300_s30  ;;  %v1699_v59 = vld [vmem:[%s3324_s4 + $0x60] sm:$0xff] }
 0x3f1   :  { %v1557_v54 = vpop.xlane.xlu0 %1556  ;;  %v1527_v8 = vpop.xlane.xlu1 %1526 }
 0x3f2   :  { %v1589_v42 = vadd.f32 %v1557_v54, %v1397_v14  ;;  %v1579_v40 = vadd.f32 %v1527_v8, %v1387_v33  ;;  %v1464_v18 = vpop.xlane.xlu2 %1463 }
 0x3f3   :  { %v1558_v6 = vadd.f32 %v1464_v18, %v1366_v2  ;;  %v1653_v50 = vld [vmem:[#allocation2 + $0xf0] sm:$0xff] }
 0x3f4   :  { %1622 = vst.msk [vmem:[#allocation2 + $0xf8] sm:$0xff] %vm50_vm4, %v1589_v42  ;;  %v1685_v1 = vmul.f32 0.0625, %v1653_v50  ;;  %v1642_v54 = vld [vmem:[#allocation2 + $0x98] sm:$0xff] }
 0x3f5   :  { %1612 = vst.msk [vmem:[#allocation2 + $0xa8] sm:$0xff] %vm50_vm4, %v1579_v40  ;;  %v1734_v40 = vld [vmem:[%s3327_s7 + $0x78] sm:$0xff] }
 0x3f6   :  { %1591 = vst.msk [vmem:[#allocation2] sm:$0xff] %vm50_vm4, %v1558_v6  ;;  %1781 = vrot.lane.b32.xlu2 %v1734_v40, %s2300_s30 }
 0x3f9   :  { %v1476_v57 = vpop.xlane.xlu0 %1475  ;;  %v1470_v37 = vpop.xlane.xlu1 %1469 }
 0x3fa   :  { %v1562_v55 = vadd.f32 %v1476_v57, %v1370_v51  ;;  %v1560_v56 = vadd.f32 %v1470_v37, %v1368_v10  ;;  %v1674_v51 = vmul.f32 0.0625, %v1642_v54  ;;  %v1720_v57 = vld [vmem:[%s3327_s7 + $0x8] sm:$0xff] }
 0x3fb   :  { %v1654_v19 = vld [vmem:[#allocation2 + $0xf8] sm:$0xff]  ;;  %1753 = vrot.lane.b32.xlu1 %v1720_v57, %s2300_s30 }
 0x3fc   :  { %1595 = vst.msk [vmem:[#allocation2 + $0x20] sm:$0xff] %vm50_vm4, %v1562_v55  ;;  %v1686_v3 = vmul.f32 0.0625, %v1654_v19  ;;  %v1644_v48 = vld [vmem:[#allocation2 + $0xa8] sm:$0xff]  ;;  %v1687_v55 = vld [vmem:[%s3324_s4] sm:$0xff] }
 0x3fd   :  { %1593 = vst.msk [vmem:[#allocation2 + $0x10] sm:$0xff] %vm50_vm4, %v1560_v56  ;;  %v1676_v33 = vmul.f32 0.0625, %v1644_v48  ;;  %v1623_v10 = vld [vmem:[#allocation2] sm:$0xff]  ;;  %v1730_v56 = vld [vmem:[%s3327_s7 + $0x58] sm:$0xff] }
 0x3fe   :  { %1864 = vmatpush.msrb.mxu3 %v1686_v3  ;;  %v1655_v37 = vmul.f32 0.0625, %v1623_v10  ;;  %1773 = vrot.lane.b32.xlu2 %v1730_v56, %s2300_s30 }
 0x400   :  { %1865 = vmatpush.msrb.mxu3 %v1685_v1  ;;  %v1688_v1 = vld [vmem:[%s3324_s4 + $0x8] sm:$0xff] }
 0x401   :  { %v1524_v39 = vpop.xlane.xlu0 %1523  ;;  %v1518_v58 = vpop.xlane.xlu1 %1517 }
 0x402   :  { %v1578_v61 = vadd.f32 %v1524_v39, %v1386_v44  ;;  %v1576_v5 = vadd.f32 %v1518_v58, %v1384_v43  ;;  %1866 = vmatpush.msrb.mxu3 %v1684_v49  ;;  %v1690_v44 = vld [vmem:[%s3324_s4 + $0x18] sm:$0xff]  ;;  %v1691_v43 = vld [vmem:[%s3324_s4 + $0x20] sm:$0xff]  ;;  %v1692_v49 = vld [vmem:[%s3324_s4 + $0x28] sm:$0xff] }
 0x403   :  { %v1627_v16 = vld [vmem:[#allocation2 + $0x20] sm:$0xff]  ;;  %v1693_v39 = vld [vmem:[%s3324_s4 + $0x30] sm:$0xff] }
 0x404   :  { %1611 = vst.msk [vmem:[#allocation2 + $0xa0] sm:$0xff] %vm50_vm4, %v1578_v61  ;;  %1867 = vmatpush.msrb.mxu3 %v1683_v41  ;;  %v1659_v21 = vmul.f32 0.0625, %v1627_v16  ;;  %v1625_v20 = vld [vmem:[#allocation2 + $0x10] sm:$0xff]  ;;  %v1721_v58 = vld [vmem:[%s3327_s7 + $0x10] sm:$0xff]  ;;  %v1695_v61 = vld [vmem:[%s3324_s4 + $0x40] sm:$0xff] }
 0x405   :  { %1609 = vst.msk [vmem:[#allocation2 + $0x90] sm:$0xff] %vm50_vm4, %v1576_v5  ;;  %v1657_v32 = vmul.f32 0.0625, %v1625_v20  ;;  %v1696_v5 = vld [vmem:[%s3324_s4 + $0x48] sm:$0xff]  ;;  %v1697_v41 = vld [vmem:[%s3324_s4 + $0x50] sm:$0xff]  ;;  %v1698_v16 = vld [vmem:[%s3324_s4 + $0x58] sm:$0xff] }
 0x406   :  { %1810 = vmatpush.msrb.mxu2 %v1659_v21  ;;  %1868 = vmatpush.msrb.mxu3 %v1682_v27  ;;  %v1701_v21 = vld [vmem:[%s3324_s4 + $0x70] sm:$0xff]  ;;  %v1702_v27 = vld [vmem:[%s3324_s4 + $0x78] sm:$0xff]  ;;  %v1703_v20 = vld [vmem:[%s3324_s4 + $0x80] sm:$0xff] }
 0x407   :  { %1767 = vrot.lane.b32.xlu2 %v1727_v23, %s2300_s30 }
 0x408   :  { %1811 = vmatpush.msrb.mxu2 %v1658_v22  ;;  %1869 = vmatpush.msrb.mxu3 %v1681_v12  ;;  %v1705_v22 = vld [vmem:[%s3324_s4 + $0x90] sm:$0xff]  ;;  %v1706_v12 = vld [vmem:[%s3324_s4 + $0x98] sm:$0xff] }
 0x409   :  { %v1512_v35 = vpop.xlane.xlu1 %1511  ;;  %v1467_v30 = vpop.xlane.xlu0 %1466 }
 0x40a   :  { %v1574_v45 = vadd.f32 %v1512_v35, %v1382_v26  ;;  %v1559_v25 = vadd.f32 %v1467_v30, %v1367_v47  ;;  %1812 = vmatpush.msrb.mxu2 %v1657_v32  ;;  %1870 = vmatpush.msrb.mxu3 %v1680_v60  ;;  %v1708_v26 = vld [vmem:[%s3324_s4 + $0xa8] sm:$0xff]  ;;  %v1709_v47 = vld [vmem:[%s3324_s4 + $0xb0] sm:$0xff]  ;;  %v1711_v60 = vld [vmem:[%s3324_s4 + $0xc0] sm:$0xff] }
 0x40b   :  { %v1643_v14 = vld [vmem:[#allocation2 + $0xa0] sm:$0xff] }
 0x40c   :  { %1607 = vst.msk [vmem:[#allocation2 + $0x80] sm:$0xff] %vm50_vm4, %v1574_v45  ;;  %1871 = vmatpush.msrb.mxu3 %v1679_v31  ;;  %v1675_v42 = vmul.f32 0.0625, %v1643_v14  ;;  %v1641_v18 = vld [vmem:[#allocation2 + $0x90] sm:$0xff]  ;;  %v1712_v35 = vld [vmem:[%s3324_s4 + $0xc8] sm:$0xff] }
 0x40d   :  { %1592 = vst.msk [vmem:[#allocation2 + $0x8] sm:$0xff] %vm50_vm4, %v1559_v25  ;;  %v1673_v29 = vmul.f32 0.0625, %v1641_v18  ;;  %v1714_v25 = vld [vmem:[%s3324_s4 + $0xd8] sm:$0xff] }
 0x40e   :  { %1872 = vmatpush.msrb.mxu3 %v1678_v11 }
 0x40f   :  { %1761 = vrot.lane.b32.xlu2 %v1724_v24, %s2300_s30 }
 0x410   :  { %1873 = vmatpush.msrb.mxu3 %v1677_v53  ;;  %v1716_v53 = vld [vmem:[%s3324_s4 + $0xe8] sm:$0xff] }
 0x411   :  { %v1515_v2 = vpop.xlane.xlu0 %1514 }
 0x412   :  { %v1575_v8 = vadd.f32 %v1515_v2, %v1383_v52  ;;  %1874 = vmatpush.msrb.mxu3 %v1676_v33  ;;  %v1718_v33 = vld [vmem:[%s3324_s4 + $0xf8] sm:$0xff] }
 0x413   :  { %v1639_v50 = vld [vmem:[#allocation2 + $0x80] sm:$0xff] }
 0x414   :  { %1608 = vst.msk [vmem:[#allocation2 + $0x88] sm:$0xff] %vm50_vm4, %v1575_v8  ;;  %1875 = vmatpush.msrb.mxu3 %v1675_v42  ;;  %v1624_v6 = vld [vmem:[#allocation2 + $0x8] sm:$0xff]  ;;  %v1671_v36 = vmul.f32 0.0625, %v1639_v50 }
 0x415   :  { %v1656_v9 = vmul.f32 0.0625, %v1624_v6 }
 0x416   :  { %1876 = vmatpush.msrb.mxu3 %v1674_v51 }
 0x417   :  { %1813 = vmatpush.msrb.mxu2 %v1656_v9  ;;  %1755 = vrot.lane.b32.xlu2 %v1721_v58, %s2300_s30 }
 0x418   :  { %1877 = vmatpush.msrb.mxu3 %v1673_v29 }
 0x419   :  { %1814 = vmatpush.msrb.mxu2 %v1655_v37 }
 0x41a   :  { %1815 = vmatmul.f32.vlgmr.msrb.gmra.mxu2 %v1687_v55 }
 0x41b   :  { %v1640_v19 = vld [vmem:[#allocation2 + $0x88] sm:$0xff] }
 0x41c   :  { %v1672_v3 = vmul.f32 0.0625, %v1640_v19 }
 0x41e   :  { %1878 = vmatpush.msrb.mxu3 %v1672_v3 }
 0x420   :  { %1879 = vmatpush.msrb.mxu3 %v1671_v36 }
 0x421   :  { %1880 = vmatmul.f32.vlgmr.msrb.gmra.mxu3 %v1688_v1  ;;  %v3221_v30 = vpop.permute.xlu1 %1777 }
 0x422   :  { %1818 = vmatmul.f32.gmra.mxu2 %v1689_v62 }
 0x424   :  { %v3202_v0 = vpop.permute.xlu0 %1779 }
 0x429   :  { %1883 = vmatmul.f32.gmra.mxu3 %v1690_v44  ;;  %v3236_v11 = vpop.permute.xlu1 %1771 }
 0x42a   :  { %1821 = vmatmul.f32.gmra.mxu2 %v1691_v43 }
 0x42c   :  { %v3213_v32 = vpop.permute.xlu0 %1775 }
 0x431   :  { %1886 = vmatmul.f32.gmra.mxu3 %v1692_v49 }
 0x432   :  { %1824 = vmatmul.f32.gmra.mxu2 %v1693_v39 }
 0x434   :  { %v3226_v45 = vpop.permute.xlu0 %1769 }
 0x439   :  { %1889 = vmatmul.f32.gmra.mxu3 %v1694_v7 }
 0x43a   :  { %1827 = vmatmul.f32.gmra.mxu2 %v1695_v61 }
 0x43c   :  { %v1764_v48 = vpop.permute.xlu0 %1763 }
 0x441   :  { %1892 = vmatmul.f32.gmra.mxu3 %v1696_v5 }
 0x442   :  { %1830 = vmatmul.f32.gmra.mxu2 %v1697_v41 }
 0x445   :  { %v1766_v52 = vpop.permute.xlu1 %1765 }
 0x447   :  { %v1758_v14 = vpop.permute.xlu0 %1757 }
 0x449   :  { %1895 = vmatmul.f32.gmra.mxu3 %v1698_v16 }
 0x44a   :  { %1833 = vmatmul.f32.gmra.mxu2 %v1699_v59 }
 0x450   :  { %v3231_v31 = vpop.permute.xlu2 %1781 }
 0x451   :  { %1898 = vmatmul.f32.gmra.mxu3 %v1700_v46 }
 0x452   :  { %1836 = vmatmul.f32.gmra.mxu2 %v1701_v21 }
 0x458   :  { %v3244_v38 = vpop.permute.xlu2 %1773 }
 0x459   :  { %1901 = vmatmul.f32.gmra.mxu3 %v1702_v27 }
 0x45a   :  { %1839 = vmatmul.f32.gmra.mxu2 %v1703_v20 }
 0x460   :  { %v1760_v54 = vpop.permute.xlu1 %1759 }
 0x461   :  { %1904 = vmatmul.f32.gmra.mxu3 %v1704_v15  ;;  %v1768_v2 = vpop.permute.xlu2 %1767  ;;  %v1752_v42 = vpop.permute.xlu0 %1751 }
 0x462   :  { %1842 = vmatmul.f32.gmra.mxu2 %v1705_v22 }
 0x469   :  { %1907 = vmatmul.f32.gmra.mxu3 %v1706_v12  ;;  %v1762_v6 = vpop.permute.xlu2 %1761 }
 0x46a   :  { %1845 = vmatmul.f32.gmra.mxu2 %v1707_v34 }
 0x46d   :  { %v1754_v9 = vpop.permute.xlu1 %1753 }
 0x471   :  { %1910 = vmatmul.f32.gmra.mxu3 %v1708_v26  ;;  %v1756_v56 = vpop.permute.xlu2 %1755 }
 0x472   :  { %1848 = vmatmul.f32.gmra.mxu2 %v1709_v47 }
 0x479   :  { %1913 = vmatmul.f32.gmra.mxu3 %v1710_v4 }
 0x47a   :  { %1851 = vmatmul.f32.gmra.mxu2 %v1711_v60 }
 0x481   :  { %1916 = vmatmul.f32.gmra.mxu3 %v1712_v35 }
 0x482   :  { %1854 = vmatmul.f32.gmra.mxu2 %v1713_v17 }
 0x489   :  { %1919 = vmatmul.f32.gmra.mxu3 %v1714_v25 }
 0x48a   :  { %1857 = vmatmul.f32.gmra.mxu2 %v1715_v63 }
 0x491   :  { %1922 = vmatmul.f32.gmra.mxu3 %v1716_v53 }
 0x492   :  { %1860 = vmatmul.f32.gmra.mxu2 %v1717_v28 }
 0x499   :  { %1925 = vmatmul.f32.gmra.mxu3 %v1718_v33 }
 0x49d   :  { %v1816_v8 = vpop.f32.mrf.mxu2 }
 0x49e   :  { %v1817_v40 = vadd.f32 %v1816_v8, %v1752_v42 }
 0x4a4   :  { %v1881_v18 = vpop.f32.mrf.mxu3 }
 0x4a5   :  { %v1819_v51 = vpop.f32.mrf.mxu2  ;;  %v3249_v10 = vadd.f32 %v1881_v18, %v1817_v40 }
 0x4a6   :  { %v1820_v29 = vadd.f32 %v1819_v51, %v1754_v9 }
 0x4ac   :  { %v1884_v57 = vpop.f32.mrf.mxu3 }
 0x4ad   :  { %v1822_v37 = vpop.f32.mrf.mxu2  ;;  %v3251_v55 = vadd.f32 %v1884_v57, %v1820_v29  ;;  %v1959_v29 = vld [vmem:[%s3327_s7 + $0xb0] sm:$0xff] }
 0x4ae   :  { %v1823_v19 = vadd.f32 %v1822_v37, %v1756_v56  ;;  %1981 = vrot.lane.b32.xlu1 %v1959_v29, %s2300_s30 }
 0x4b4   :  { %v1887_v50 = vpop.f32.mrf.mxu3 }
 0x4b5   :  { %v1825_v3 = vpop.f32.mrf.mxu2  ;;  %v3253_v36 = vadd.f32 %v1887_v50, %v1823_v19 }
 0x4b6   :  { %v1826_v1 = vadd.f32 %v1825_v3, %v1758_v14 }
 0x4bc   :  { %v1890_v62 = vpop.f32.mrf.mxu3 }
 0x4bd   :  { %v1828_v23 = vpop.f32.mrf.mxu2  ;;  %v3255_v44 = vadd.f32 %v1890_v62, %v1826_v1 }
 0x4be   :  { %v1829_v43 = vadd.f32 %v1828_v23, %v1760_v54  ;;  %v1953_v23 = vld [vmem:[%s3327_s7 + $0x80] sm:$0xff] }
 0x4c4   :  { %v1893_v24 = vpop.f32.mrf.mxu3 }
 0x4c5   :  { %v1831_v49 = vpop.f32.mrf.mxu2  ;;  %v3257_v39 = vadd.f32 %v1893_v24, %v1829_v43 }
 0x4c6   :  { %v1832_v58 = vadd.f32 %v1831_v49, %v1762_v6 }
 0x4c7   :  { %v1933_v49 = vmax.f32 %v3257_v39, 0.0  ;;  %v1945_v39 = vld [vmem:[#allocation3] sm:$0xff] }
 0x4cc   :  { %v1896_v7 = vpop.f32.mrf.mxu3 }
 0x4cd   :  { %v1834_v61 = vpop.f32.mrf.mxu2  ;;  %v3259_v5 = vadd.f32 %v1896_v7, %v1832_v58  ;;  %v1932_v58 = vmax.f32 %v3255_v44, 0.0  ;;  %v1958_v7 = vld [vmem:[%s3327_s7 + $0xa8] sm:$0xff]  ;;  %v1955_v44 = vld [vmem:[%s3327_s7 + $0x90] sm:$0xff] }
 0x4ce   :  { %v1835_v41 = vadd.f32 %v1834_v61, %v1764_v48  ;;  %v1931_v61 = vmax.f32 %v3253_v36, 0.0  ;;  %1979 = vrot.lane.b32.xlu0 %v1958_v7, %s2300_s30  ;;  %v1960_v36 = vld [vmem:[%s3327_s7 + $0xb8] sm:$0xff] }
 0x4cf   :  { %v1934_v24 = vmax.f32 %v3259_v5, 0.0  ;;  %v1929_v5 = vmax.f32 %v3249_v10, 0.0  ;;  %1983 = vrot.lane.b32.xlu2 %v1960_v36, %s2300_s30  ;;  %v1957_v10 = vld [vmem:[%s3327_s7 + $0xa0] sm:$0xff] }
 0x4d4   :  { %v1899_v16 = vpop.f32.mrf.mxu3 }
 0x4d5   :  { %v1837_v59 = vpop.f32.mrf.mxu2  ;;  %v1900_v46 = vadd.f32 %v1899_v16, %v1835_v41  ;;  %v1930_v41 = vmax.f32 %v3251_v55, 0.0  ;;  %v1946_v55 = vld [vmem:[#allocation3 + $0x8] sm:$0xff]  ;;  %v1947_v16 = vld [vmem:[#allocation3 + $0x10] sm:$0xff] }
 0x4d6   :  { %v1838_v21 = vadd.f32 %v1837_v59, %v1766_v52  ;;  %1973 = vrot.lane.b32.xlu0 %v1955_v44, %s2300_s30  ;;  %v1954_v59 = vld [vmem:[%s3327_s7 + $0x88] sm:$0xff] }
 0x4d7   :  { %v1935_v43 = vmax.f32 %v1900_v46, 0.0  ;;  %1977 = vrot.lane.b32.xlu2 %v1957_v10, %s2300_s30  ;;  %v1948_v46 = vld [vmem:[#allocation3 + $0x18] sm:$0xff] }
 0x4dc   :  { %v1902_v27 = vpop.f32.mrf.mxu3 }
 0x4dd   :  { %v1840_v20 = vpop.f32.mrf.mxu2  ;;  %v1903_v15 = vadd.f32 %v1902_v27, %v1838_v21  ;;  %v1949_v21 = vld [vmem:[#allocation3 + $0x20] sm:$0xff]  ;;  %v1950_v27 = vld [vmem:[#allocation3 + $0x28] sm:$0xff] }
 0x4de   :  { %v1841_v22 = vadd.f32 %v1840_v20, %v1768_v2  ;;  %v1951_v20 = vld [vmem:[#allocation3 + $0x30] sm:$0xff] }
 0x4df   :  { %v1936_v62 = vmax.f32 %v1903_v15, 0.0  ;;  %1971 = vrot.lane.b32.xlu2 %v1954_v59, %s2300_s30  ;;  %v1952_v15 = vld [vmem:[#allocation3 + $0x38] sm:$0xff] }
 0x4e4   :  { %v1905_v12 = vpop.f32.mrf.mxu3 }
 0x4e5   :  { %v1843_v34 = vpop.f32.mrf.mxu2  ;;  %v1906_v26 = vadd.f32 %v1905_v12, %v1841_v22 }
 0x4ec   :  { %v1908_v47 = vpop.f32.mrf.mxu3 }
 0x4ed   :  { %v1846_v4 = vpop.f32.mrf.mxu2 }
 0x4ee   :  { %v1847_v57 = vadd.f32 %v1846_v4, %v3236_v11  ;;  %v1956_v11 = vld [vmem:[%s3327_s7 + $0x98] sm:$0xff] }
 0x4ef   :  { %1975 = vrot.lane.b32.xlu1 %v1956_v11, %s2300_s30 }
 0x4f4   :  { %v1911_v60 = vpop.f32.mrf.mxu3 }
 0x4f5   :  { %v1849_v35 = vpop.f32.mrf.mxu2  ;;  %v1912_v56 = vadd.f32 %v1911_v60, %v1847_v57 }
 0x4f6   :  { %v1850_v6 = vadd.f32 %v1849_v35, %v3244_v38  ;;  %v2043_v35 = vld [vmem:[%s3327_s7] sm:$0xf] }
 0x4f7   :  { %v1939_v3 = vmax.f32 %v1912_v56, 0.0  ;;  %1969 = vrot.lane.b32.xlu1 %v1953_v23, %s2300_s30  ;;  %s2301_s30 = smov 124   ;;  %v2042_v56 = vld [vmem:[%s3326_s6] sm:$0xf] }
 0x4f8   :  { %2045 = vrot.lane.b32.xlu0 %v2043_v35, %s2301_s30 }
 0x4fc   :  { %v1914_v17 = vpop.f32.mrf.mxu3 }
 0x4fd   :  { %v1852_v25 = vpop.f32.mrf.mxu2 }
 0x4fe   :  { %v1853_v42 = vadd.f32 %v1852_v25, %v3213_v32  ;;  %v1915_v32 = vadd.f32 %v1914_v17, %v1850_v6 }
 0x500   :  { %v1940_v50 = vmax.f32 %v1915_v32, 0.0 }
 0x504   :  { %v1917_v63 = vpop.f32.mrf.mxu3 }
 0x505   :  { %v1855_v53 = vpop.f32.mrf.mxu2 }
 0x506   :  { %v1856_v52 = vadd.f32 %v1855_v53, %v3221_v30  ;;  %v1918_v30 = vadd.f32 %v1917_v63, %v1853_v42 }
 0x508   :  { %v1941_v38 = vmax.f32 %v1918_v30, 0.0 }
 0x50c   :  { %v1920_v48 = vpop.f32.mrf.mxu3 }
 0x50d   :  { %v1858_v28 = vpop.f32.mrf.mxu2  ;;  %v1921_v51 = vadd.f32 %v1920_v48, %v1856_v52 }
 0x50e   :  { %v1859_v54 = vadd.f32 %v1858_v28, %v3202_v0  ;;  %v1844_v0 = vadd.f32 %v1843_v34, %v3226_v45  ;;  %v1937_v45 = vmax.f32 %v1906_v26, 0.0 }
 0x510   :  { %v1909_v19 = vadd.f32 %v1908_v47, %v1844_v0 }
 0x512   :  { %v1938_v1 = vmax.f32 %v1909_v19, 0.0 }
 0x514   :  { %v1923_v14 = vpop.f32.mrf.mxu3 }
 0x515   :  { %v1861_v33 = vpop.f32.mrf.mxu2  ;;  %v1924_v40 = vadd.f32 %v1923_v14, %v1859_v54 }
 0x516   :  { %v1862_v2 = vadd.f32 %v1861_v33, %v3231_v31  ;;  %v1942_v31 = vmax.f32 %v1921_v51, 0.0 }
 0x517   :  { %v1943_v37 = vmax.f32 %v1924_v40, 0.0 }
 0x51c   :  { %v1926_v8 = vpop.f32.mrf.mxu3 }
 0x51d   :  { %v1927_v18 = vadd.f32 %v1926_v8, %v1862_v2 }
 0x51f   :  { %v1944_v9 = vmax.f32 %v1927_v18, 0.0 }
 0x520   :  { %v1982_v17 = vpop.permute.xlu1 %1981 }
 0x521   :  { %1993 = vmatpush.msra.mxu2 %v1944_v9 }
 0x523   :  { %1994 = vmatpush.msra.mxu2 %v1943_v37 }
 0x525   :  { %1995 = vmatpush.msra.mxu2 %v1942_v31 }
 0x527   :  { %1996 = vmatpush.msra.mxu2 %v1941_v38 }
 0x529   :  { %1997 = vmatpush.msra.mxu2 %v1940_v50  ;;  %v1984_v60 = vpop.permute.xlu2 %1983 }
 0x52b   :  { %1998 = vmatpush.msra.mxu2 %v1939_v3 }
 0x52d   :  { %1999 = vmatpush.msra.mxu2 %v1938_v1 }
 0x52f   :  { %2000 = vmatpush.msra.mxu2 %v1937_v45 }
 0x531   :  { %2001 = vmatpush.msra.mxu2 %v1936_v62  ;;  %v1978_v53 = vpop.permute.xlu2 %1977 }
 0x533   :  { %2002 = vmatpush.msra.mxu2 %v1935_v43 }
 0x535   :  { %2003 = vmatpush.msra.mxu2 %v1934_v24 }
 0x537   :  { %2004 = vmatpush.msra.mxu2 %v1933_v49 }
 0x539   :  { %2005 = vmatpush.msra.mxu2 %v1932_v58  ;;  %v1972_v6 = vpop.permute.xlu2 %1971 }
 0x53b   :  { %2006 = vmatpush.msra.mxu2 %v1931_v61 }
 0x53d   :  { %2007 = vmatpush.msra.mxu2 %v1930_v41 }
 0x53f   :  { %2008 = vmatpush.msra.mxu2 %v1929_v5 }
 0x540   :  { %2009 = vmatmul.f32.vlgmr.msra.gmra.mxu2 %v1945_v39  ;;  %v1980_v63 = vpop.permute.xlu0 %1979 }
 0x548   :  { %2012 = vmatmul.f32.gmra.mxu2 %v1946_v55  ;;  %v1974_v42 = vpop.permute.xlu0 %1973 }
 0x550   :  { %2015 = vmatmul.f32.gmra.mxu2 %v1947_v16 }
 0x558   :  { %2018 = vmatmul.f32.gmra.mxu2 %v1948_v46 }
 0x560   :  { %2021 = vmatmul.f32.gmra.mxu2 %v1949_v21 }
 0x561   :  { %v1976_v48 = vpop.permute.xlu1 %1975 }
 0x568   :  { %2024 = vmatmul.f32.gmra.mxu2 %v1950_v27 }
 0x569   :  { %v1970_v29 = vpop.permute.xlu1 %1969 }
 0x56a   :  { %v2046_v38 = vpop.permute.xlu0 %2045 }
 0x570   :  { %2027 = vmatmul.f32.gmra.mxu2 %v1951_v20 }
 0x578   :  { %2030 = vmatmul.f32.gmra.mxu2 %v1952_v15 }
 0x5c3   :  { %v2010_v22 = vpop.f32.mrf.mxu2 }
 0x5c4   :  { %v2011_v37 = vadd.f32 %v2010_v22, %v1970_v29 }
 0x5c6   :  { %v2034_v31 = vmax.f32 %v2011_v37, 0.0 }
 0x5cb   :  { %v2013_v12 = vpop.f32.mrf.mxu2 }
 0x5cc   :  { %v2014_v57 = vadd.f32 %v2013_v12, %v1972_v6 }
 0x5ce   :  { %v2035_v32 = vmax.f32 %v2014_v57, 0.0 }
 0x5d3   :  { %v2016_v34 = vpop.f32.mrf.mxu2 }
 0x5d4   :  { %v2017_v51 = vadd.f32 %v2016_v34, %v1974_v42 }
 0x5d6   :  { %v2036_v0 = vmax.f32 %v2017_v51, 0.0 }
 0x5db   :  { %v2019_v26 = vpop.f32.mrf.mxu2 }
 0x5dc   :  { %v2020_v40 = vadd.f32 %v2019_v26, %v1976_v48 }
 0x5de   :  { %v2037_v30 = vmax.f32 %v2020_v40, 0.0 }
 0x5e3   :  { %v2022_v47 = vpop.f32.mrf.mxu2 }
 0x5e4   :  { %v2023_v2 = vadd.f32 %v2022_v47, %v1978_v53 }
 0x5e6   :  { %v2038_v9 = vmax.f32 %v2023_v2, 0.0 }
 0x5eb   :  { %v2025_v4 = vpop.f32.mrf.mxu2 }
 0x5ec   :  { %v2026_v52 = vadd.f32 %v2025_v4, %v1980_v63 }
 0x5ee   :  { %v2039_v18 = vmax.f32 %v2026_v52, 0.0 }
 0x5f3   :  { %v2028_v25 = vpop.f32.mrf.mxu2 }
 0x5f4   :  { %v2029_v14 = vadd.f32 %v2028_v25, %v1982_v17 }
 0x5f6   :  { %v2040_v8 = vmax.f32 %v2029_v14, 0.0 }
 0x5fb   :  { %v2031_v28 = vpop.f32.mrf.mxu2 }
 0x5fc   :  { %v2032_v33 = vadd.f32 %v2031_v28, %v1984_v60 }
 0x5fe   :  { %v2041_v54 = vmax.f32 %v2032_v33, 0.0 }
 0x600   :  { %2059 = vmatpush.msra.mxu3 %v2041_v54 }
 0x602   :  { %2060 = vmatpush.msra.mxu3 %v2040_v8 }
 0x604   :  { %2061 = vmatpush.msra.mxu3 %v2039_v18 }
 0x606   :  { %2062 = vmatpush.msra.mxu3 %v2038_v9 }
 0x608   :  { %2063 = vmatpush.msra.mxu3 %v2037_v30 }
 0x60a   :  { %2064 = vmatpush.msra.mxu3 %v2036_v0 }
 0x60c   :  { %2065 = vmatpush.msra.mxu3 %v2035_v32 }
 0x60e   :  { %2066 = vmatpush.msra.mxu3 %v2034_v31 }
 0x60f   :  { %2215 = vmatmul.msk.f32.vlgmr.msra.gmra.mxu3 %vm424_vm2, %v2042_v56 }
 0x692   :  { %v2068_v19 = vpop.f32.mrf.mxu3 }
 0x693   :  { %v2069_v50 = vadd.f32 %v2068_v19, %v2046_v38 }
 0x695   :  { %2072 = vst.msk [vmem:[%s3328_s8] sm:$0xf] %vm83_vm5, %v2069_v50 }
 0x696   :  { %2077 = vsyncpa [#allocation4], 1 }

</bundles_post_ra>
